<compile_context>
chip_gen: v6e
topology: v6e:2x2x1
jax: 0.10.0
libtpu: 0.0.40
codegen_flags: <defaults>
</compile_context>

<pallas_src>
import functools

import jax
import jax.numpy as jnp
from jax.experimental import pallas as pl
from jax.experimental.pallas import tpu as pltpu


def _round_up(x, m):
    return (x + m - 1) // m * m


# ----------------------- Tiled matmul (+bias [+ReLU]) -----------------------

def _matmul_kernel(x_ref, w_ref, b_ref, o_ref, acc_ref, *, relu):
    @pl.when(pl.program_id(2) == 0)
    def _():
        acc_ref[...] = jnp.zeros_like(acc_ref)

    acc_ref[...] += jnp.dot(x_ref[...], w_ref[...],
                            preferred_element_type=jnp.float32)

    @pl.when(pl.program_id(2) == pl.num_programs(2) - 1)
    def _():
        y = acc_ref[...] + b_ref[...]
        if relu:
            y = jnp.maximum(y, 0.0)
        o_ref[...] = y.astype(o_ref.dtype)


def linear(x, w, b, *, relu=False, tm=256, tn=512, tk=512):
    """x: (M, K) f32, w: (K, N) f32, b: (1, N) f32 -> (M, N) f32.

    Grid-tiled, (8,128)-aligned (inputs zero-padded), bf16 operands, f32 accumulation.
    """
    M, K = x.shape
    N = w.shape[1]
    tm = min(tm, _round_up(M, 8))
    tn = min(tn, _round_up(N, 128))
    tk = min(tk, _round_up(K, 128))
    Mp, Kp, Np = _round_up(M, tm), _round_up(K, tk), _round_up(N, tn)

    xp = jnp.pad(x, ((0, Mp - M), (0, Kp - K))).astype(jnp.bfloat16)
    wp = jnp.pad(w, ((0, Kp - K), (0, Np - N))).astype(jnp.bfloat16)
    bp = jnp.pad(b, ((0, 0), (0, Np - N)))

    out = pl.pallas_call(
        functools.partial(_matmul_kernel, relu=relu),
        out_shape=jax.ShapeDtypeStruct((Mp, Np), jnp.float32),
        grid_spec=pltpu.PrefetchScalarGridSpec(
            num_scalar_prefetch=0,
            grid=(Mp // tm, Np // tn, Kp // tk),
            in_specs=[
                pl.BlockSpec((tm, tk), lambda i, j, k: (i, k)),
                pl.BlockSpec((tk, tn), lambda i, j, k: (k, j)),
                pl.BlockSpec((1, tn), lambda i, j, k: (0, j)),
            ],
            out_specs=pl.BlockSpec((tm, tn), lambda i, j, k: (i, j)),
            scratch_shapes=[pltpu.VMEM((tm, tn), jnp.float32)],
        ),
        compiler_params=pltpu.CompilerParams(
            dimension_semantics=("parallel", "parallel", "arbitrary")),
    )(xp, wp, bp)
    return out[:M, :N]


# --------------------------- Fused encoder kernel ----------------------------

def _encoder_kernel(x_ref, w1_ref, b1_ref, w2_ref, b2_ref, o_ref):
    # x_ref: (B, C, H*W).  GAP + backbone projection + fc + ReLU in one kernel.
    feats = jnp.mean(x_ref[...], axis=-1)                                  # (B, C)
    y = jnp.dot(feats.astype(jnp.bfloat16), w1_ref[...],
                preferred_element_type=jnp.float32) + b1_ref[...]          # (B, 2048)
    y = jnp.dot(y.astype(jnp.bfloat16), w2_ref[...],
                preferred_element_type=jnp.float32) + b2_ref[...]          # (B, E)
    o_ref[...] = jnp.maximum(y, 0.0).astype(o_ref.dtype)


def encoder_forward(params, imgs):
    B, C, H, W = imgs.shape
    E = params["enc_fc_w"].shape[1]
    xr = imgs.reshape(B, C, H * W)
    return pl.pallas_call(
        _encoder_kernel,
        out_shape=jax.ShapeDtypeStruct((B, E), jnp.float32),
    )(xr,
      params["backbone_w"].astype(jnp.bfloat16), params["backbone_b"],
      params["enc_fc_w"].astype(jnp.bfloat16), params["enc_fc_b"])


# --------------------- Fused multi-layer LSTM recurrence ---------------------

def _lstm_stack_kernel(g0_ref, whh_ref, wih_ref, br_ref, o_ref,
                       h_scr, c_scr, *, hidden, num_layers):
    t = pl.program_id(0)

    @pl.when(t == 0)
    def _():
        h_scr[...] = jnp.zeros_like(h_scr)
        c_scr[...] = jnp.zeros_like(c_scr)

    def cell(gates, c_prev):
        # PyTorch gate order: i, f, g, o.  Pointwise math stays f32 (v5e-safe).
        i = jax.nn.sigmoid(gates[:, 0 * hidden:1 * hidden])
        f = jax.nn.sigmoid(gates[:, 1 * hidden:2 * hidden])
        g = jnp.tanh(gates[:, 2 * hidden:3 * hidden])
        o = jax.nn.sigmoid(gates[:, 3 * hidden:4 * hidden])
        c = f * c_prev + i * g
        h = o * jnp.tanh(c)
        return h, c

    layer_in_h = None
    for l in range(num_layers):            # static Python unroll over layers
        h_prev = h_scr[l]                   # (B, H) f32, VMEM-resident
        c_prev = c_scr[l]
        rec = jnp.dot(h_prev.astype(jnp.bfloat16), whh_ref[l],
                      preferred_element_type=jnp.float32)
        if l == 0:
            # x @ W_ih + (b_ih + b_hh) precomputed for all timesteps (hoisted matmul).
            gates = g0_ref[0] + rec
        else:
            gates = (jnp.dot(layer_in_h.astype(jnp.bfloat16), wih_ref[l - 1],
                             preferred_element_type=jnp.float32)
                     + rec + br_ref[l - 1])
        h_new, c_new = cell(gates, c_prev)
        h_scr[l] = h_new
        c_scr[l] = c_new
        layer_in_h = h_new

    o_ref[0] = layer_in_h.astype(o_ref.dtype)


def lstm_stack(x, lstm_params):
    """x: (T, B, E) f32 -> (T, B, H) f32, all LSTM layers fused in one pallas_call."""
    T, B, E = x.shape
    L = len(lstm_params)
    H = lstm_params[0]["w_hh"].shape[0]

    # Hoisted input-to-hidden matmul for layer 0 (bias folded in): one big MXU matmul.
    g0 = linear(x.reshape(T * B, E), lstm_params[0]["w_ih"], lstm_params[0]["b"])
    g0 = g0.reshape(T, B, 4 * H)

    whh = jnp.stack([p["w_hh"] for p in lstm_params]).astype(jnp.bfloat16)      # (L,H,4H)
    if L > 1:
        wih_r = jnp.stack([p["w_ih"] for p in lstm_params[1:]]).astype(jnp.bfloat16)
        b_r = jnp.stack([p["b"] for p in lstm_params[1:]])
    else:  # dummies, never read inside the kernel
        wih_r = jnp.zeros((1, H, 4 * H), jnp.bfloat16)
        b_r = jnp.zeros((1, 1, 4 * H), jnp.float32)
    Lr = wih_r.shape[0]

    # TODO(synk): at large H consider pipeline_mode=pl.Buffered(1) on the loop-invariant
    #             weight BlockSpecs to avoid double-buffered VMEM residency (v7x budget).
    return pl.pallas_call(
        functools.partial(_lstm_stack_kernel, hidden=H, num_layers=L),
        out_shape=jax.ShapeDtypeStruct((T, B, H), jnp.float32),
        grid_spec=pltpu.PrefetchScalarGridSpec(
            num_scalar_prefetch=0,
            grid=(T,),
            in_specs=[
                pl.BlockSpec((1, B, 4 * H), lambda t: (t, 0, 0)),   # precomputed gates_x
                pl.BlockSpec((L, H, 4 * H), lambda t: (0, 0, 0)),   # W_hh (all layers)
                pl.BlockSpec((Lr, H, 4 * H), lambda t: (0, 0, 0)),  # W_ih (layers 1..L-1)
                pl.BlockSpec((Lr, 1, 4 * H), lambda t: (0, 0, 0)),  # biases (layers 1..L-1)
            ],
            out_specs=pl.BlockSpec((1, B, H), lambda t: (t, 0, 0)),
            scratch_shapes=[pltpu.VMEM((L, B, H), jnp.float32),     # h per layer
                            pltpu.VMEM((L, B, H), jnp.float32)],    # c per layer
        ),
        compiler_params=pltpu.CompilerParams(
            dimension_semantics=("arbitrary",)),   # time recurrence is sequential
    )(g0, whh, wih_r, b_r)


# ------------------------------ Model wrapper -------------------------------

RESNET_FEAT = 2048  # resnet50 fc.in_features


def init_params(key, *, in_chans, embed_dim, decoder_dim, voc_size, num_layers):
    ks = jax.random.split(key, 8 + num_layers)
    s = 0.05
    params = {
        # stand-in backbone projection (GAP features -> 2048 resnet features)
        "backbone_w": s * jax.random.normal(ks[0], (in_chans, RESNET_FEAT), jnp.float32),
        "backbone_b": s * jax.random.normal(ks[1], (1, RESNET_FEAT), jnp.float32),
        # resnet.fc replacement: 2048 -> embed_dim
        "enc_fc_w": s * jax.random.normal(ks[2], (RESNET_FEAT, embed_dim), jnp.float32),
        "enc_fc_b": s * jax.random.normal(ks[3], (1, embed_dim), jnp.float32),
        # decoder embedding table
        "embed": s * jax.random.normal(ks[4], (voc_size, embed_dim), jnp.float32),
        # decoder output fc: decoder_dim -> voc_size
        "fc_w": s * jax.random.normal(ks[5], (decoder_dim, voc_size), jnp.float32),
        "fc_b": s * jax.random.normal(ks[6], (1, voc_size), jnp.float32),
        "lstm": [],
    }
    for layer in range(num_layers):
        in_dim = embed_dim if layer == 0 else decoder_dim
        k0, k1, k2 = jax.random.split(ks[8 + layer], 3)
        params["lstm"].append({
            "w_ih": s * jax.random.normal(k0, (in_dim, 4 * decoder_dim), jnp.float32),
            "w_hh": s * jax.random.normal(k1, (decoder_dim, 4 * decoder_dim), jnp.float32),
            # combined b_ih + b_hh
            "b": s * jax.random.normal(k2, (1, 4 * decoder_dim), jnp.float32),
        })
    return params


def model_forward(params, imgs, captions):
    """
    imgs:     (B, C, H, W) float32   (NCHW)
    captions: (T, B)       int32     (seq-first, like PyTorch LSTM default)
    returns:  (T+1, B, voc_size) float32
    """
    # ---------------- Encoder (fused GAP + proj + fc + ReLU) ----------------
    enc = encoder_forward(params, imgs)                      # (B, E)
    # dropout(p=0.5): identity (eval semantics)

    # ---------------- Decoder ----------------
    emb = jnp.take(params["embed"], captions, axis=0)        # (T, B, E)  gather is glue
    x = jnp.concatenate([enc[None], emb], axis=0)            # (T+1, B, E)

    h = lstm_stack(x, params["lstm"])                        # (T+1, B, H)

    T1, B, H = h.shape
    out = linear(h.reshape(T1 * B, H), params["fc_w"], params["fc_b"])  # (T1*B, V)
    return out.reshape(T1, B, -1)


# --------------------------------- Driver -----------------------------------

if __name__ == "__main__":
    # Small, module-consistent shapes.
    B, C, HW = 2, 3, 16          # batch, image channels, spatial
    T = 7                        # caption length
    embed_dim = 32
    decoder_dim = 32
    voc_size = 128
    num_layers = 2

    key = jax.random.PRNGKey(0)
    k_param, k_img, k_cap = jax.random.split(key, 3)

    params = init_params(k_param, in_chans=C, embed_dim=embed_dim,
                         decoder_dim=decoder_dim, voc_size=voc_size,
                         num_layers=num_layers)

    imgs = jax.random.normal(k_img, (B, C, HW, HW), jnp.float32)
    captions = jax.random.randint(k_cap, (T, B), 0, voc_size, dtype=jnp.int32)

    out = jax.jit(model_forward)(params, imgs, captions)
    out = jax.block_until_ready(out)

    assert out.shape == (T + 1, B, voc_size), out.shape
    assert jnp.all(jnp.isfinite(out))
    print("KERNEL_OK")
</pallas_src>

<mosaic_0001>
module attributes {stable_mosaic.version = 11 : i64} {
  func.func @_encoder_kernel(%arg0: memref<2x3x256xf32, #tpu.memory_space<vmem>>, %arg1: memref<3x2048xbf16, #tpu.memory_space<vmem>>, %arg2: memref<1x2048xf32, #tpu.memory_space<vmem>>, %arg3: memref<2048x32xbf16, #tpu.memory_space<vmem>>, %arg4: memref<1x32xf32, #tpu.memory_space<vmem>>, %arg5: memref<2x32xf32, #tpu.memory_space<vmem>>) attributes {dimension_semantics = [], scalar_prefetch = 0 : i64, scratch_operands = 0 : i64, tpu.core_type = #tpu.core_type<tc>} {
    %c0 = arith.constant 0 : index
    %c0_0 = arith.constant 0 : index
    %c0_1 = arith.constant 0 : index
    %0 = vector.load %arg0[%c0, %c0_0, %c0_1] : memref<2x3x256xf32, #tpu.memory_space<vmem>>, vector<2x3x256xf32>
    %cst = arith.constant dense<0.000000e+00> : vector<2x3xf32>
    %1 = vector.multi_reduction <add>, %0, %cst [2] : vector<2x3x256xf32> to vector<2x3xf32>
    %cst_2 = arith.constant 2.560000e+02 : f32
    %2 = vector.broadcast %cst_2 : f32 to vector<2x3xf32>
    %3 = arith.divf %1, %2 : vector<2x3xf32>
    %4 = arith.truncf %3 : vector<2x3xf32> to vector<2x3xbf16>
    %c0_3 = arith.constant 0 : index
    %c0_4 = arith.constant 0 : index
    %5 = vector.load %arg1[%c0_3, %c0_4] : memref<3x2048xbf16, #tpu.memory_space<vmem>>, vector<3x2048xbf16>
    %cst_5 = arith.constant dense<0.000000e+00> : vector<2x2048xf32>
    %6 = tpu.matmul %4, %5, %cst_5 {dimension_numbers = #tpu.dot_dimension_numbers<[1], [0], [0], [1], [0, 0, 1, 1], [], []>} : vector<2x3xbf16>, vector<3x2048xbf16>, vector<2x2048xf32> -> vector<2x2048xf32>
    %c0_6 = arith.constant 0 : index
    %c0_7 = arith.constant 0 : index
    %7 = vector.load %arg2[%c0_6, %c0_7] : memref<1x2048xf32, #tpu.memory_space<vmem>>, vector<1x2048xf32>
    %8 = vector.broadcast %7 : vector<1x2048xf32> to vector<2x2048xf32>
    %9 = arith.addf %6, %8 : vector<2x2048xf32>
    %10 = arith.truncf %9 : vector<2x2048xf32> to vector<2x2048xbf16>
    %c0_8 = arith.constant 0 : index
    %c0_9 = arith.constant 0 : index
    %11 = vector.load %arg3[%c0_8, %c0_9] : memref<2048x32xbf16, #tpu.memory_space<vmem>>, vector<2048x32xbf16>
    %cst_10 = arith.constant dense<0.000000e+00> : vector<2x32xf32>
    %12 = tpu.matmul %10, %11, %cst_10 {dimension_numbers = #tpu.dot_dimension_numbers<[1], [0], [0], [1], [0, 0, 1, 1], [], []>} : vector<2x2048xbf16>, vector<2048x32xbf16>, vector<2x32xf32> -> vector<2x32xf32>
    %c0_11 = arith.constant 0 : index
    %c0_12 = arith.constant 0 : index
    %13 = vector.load %arg4[%c0_11, %c0_12] : memref<1x32xf32, #tpu.memory_space<vmem>>, vector<1x32xf32>
    %14 = vector.broadcast %13 : vector<1x32xf32> to vector<2x32xf32>
    %15 = arith.addf %12, %14 : vector<2x32xf32>
    %cst_13 = arith.constant 0.000000e+00 : f32
    %16 = vector.broadcast %cst_13 : f32 to vector<2x32xf32>
    %17 = arith.maximumf %15, %16 : vector<2x32xf32>
    %c0_14 = arith.constant 0 : index
    %c0_15 = arith.constant 0 : index
    %18 = vector.load %arg5[%c0_14, %c0_15] : memref<2x32xf32, #tpu.memory_space<vmem>>, vector<2x32xf32>
    tpu.vector_store %arg5[%c0_14, %c0_15], %17 {strides = array<i32>} : memref<2x32xf32, #tpu.memory_space<vmem>>, vector<2x32xf32>,
    return
  }
}

module attributes {stable_mosaic.version = 11 : i64} {
  func.func @_matmul_kernel(%arg0: i32, %arg1: i32, %arg2: i32, %arg3: memref<16x128xbf16, #tpu.memory_space<vmem>>, %arg4: memref<128x128xbf16, #tpu.memory_space<vmem>>, %arg5: memref<1x128xf32, #tpu.memory_space<vmem>>, %arg6: memref<16x128xf32, #tpu.memory_space<vmem>>, %arg7: memref<16x128xf32, #tpu.memory_space<vmem>>) attributes {dimension_semantics = [#tpu.dimension_semantics<parallel>, #tpu.dimension_semantics<parallel>, #tpu.dimension_semantics<arbitrary>], iteration_bounds = array<i64: 1, 1, 1>, scalar_prefetch = 0 : i64, scratch_operands = 1 : i64, tpu.core_type = #tpu.core_type<tc>, window_params = [{transform_indices = @transform_0, window_bounds = array<i64: 16, 128>}, {transform_indices = @transform_1, window_bounds = array<i64: 128, 128>}, {transform_indices = @transform_2, window_bounds = array<i64: 1, 128>}, {transform_indices = @transform_3, window_bounds = array<i64: 16, 128>}]} {
    %c0_i32 = arith.constant 0 : i32
    %0 = arith.cmpi eq, %arg2, %c0_i32 : i32
    %1 = arith.extui %0 : i1 to i32
    %c0_i32_0 = arith.constant 0 : i32
    %2 = arith.cmpi ne, %1, %c0_i32_0 : i32
    scf.if %2 {
      %cst_10 = arith.constant 0.000000e+00 : f32
      %12 = vector.broadcast %cst_10 : f32 to vector<16x128xf32>
      %c0_11 = arith.constant 0 : index
      %c0_12 = arith.constant 0 : index
      %13 = vector.load %arg7[%c0_11, %c0_12] : memref<16x128xf32, #tpu.memory_space<vmem>>, vector<16x128xf32>
      tpu.vector_store %arg7[%c0_11, %c0_12], %12 {strides = array<i32>} : memref<16x128xf32, #tpu.memory_space<vmem>>, vector<16x128xf32>,
    } else {
    }
    %c0 = arith.constant 0 : index
    %c0_1 = arith.constant 0 : index
    %3 = vector.load %arg7[%c0, %c0_1] : memref<16x128xf32, #tpu.memory_space<vmem>>, vector<16x128xf32>
    %c0_2 = arith.constant 0 : index
    %c0_3 = arith.constant 0 : index
    %4 = vector.load %arg3[%c0_2, %c0_3] : memref<16x128xbf16, #tpu.memory_space<vmem>>, vector<16x128xbf16>
    %c0_4 = arith.constant 0 : index
    %c0_5 = arith.constant 0 : index
    %5 = vector.load %arg4[%c0_4, %c0_5] : memref<128x128xbf16, #tpu.memory_space<vmem>>, vector<128x128xbf16>
    %cst = arith.constant dense<0.000000e+00> : vector<16x128xf32>
    %6 = tpu.matmul %4, %5, %cst {dimension_numbers = #tpu.dot_dimension_numbers<[1], [0], [0], [1], [0, 0, 1, 1], [], []>} : vector<16x128xbf16>, vector<128x128xbf16>, vector<16x128xf32> -> vector<16x128xf32>
    %7 = arith.addf %3, %6 : vector<16x128xf32>
    %c0_6 = arith.constant 0 : index
    %c0_7 = arith.constant 0 : index
    %8 = vector.load %arg7[%c0_6, %c0_7] : memref<16x128xf32, #tpu.memory_space<vmem>>, vector<16x128xf32>
    tpu.vector_store %arg7[%c0_6, %c0_7], %7 {strides = array<i32>} : memref<16x128xf32, #tpu.memory_space<vmem>>, vector<16x128xf32>,
    %c0_i32_8 = arith.constant 0 : i32
    %9 = arith.cmpi eq, %arg2, %c0_i32_8 : i32
    %10 = arith.extui %9 : i1 to i32
    %c0_i32_9 = arith.constant 0 : i32
    %11 = arith.cmpi ne, %10, %c0_i32_9 : i32
    scf.if %11 {
      %c0_10 = arith.constant 0 : index
      %c0_11 = arith.constant 0 : index
      %12 = vector.load %arg7[%c0_10, %c0_11] : memref<16x128xf32, #tpu.memory_space<vmem>>, vector<16x128xf32>
      %c0_12 = arith.constant 0 : index
      %c0_13 = arith.constant 0 : index
      %13 = vector.load %arg5[%c0_12, %c0_13] : memref<1x128xf32, #tpu.memory_space<vmem>>, vector<1x128xf32>
      %14 = vector.broadcast %13 : vector<1x128xf32> to vector<16x128xf32>
      %15 = arith.addf %12, %14 : vector<16x128xf32>
      %c0_14 = arith.constant 0 : index
      %c0_15 = arith.constant 0 : index
      %16 = vector.load %arg6[%c0_14, %c0_15] : memref<16x128xf32, #tpu.memory_space<vmem>>, vector<16x128xf32>
      tpu.vector_store %arg6[%c0_14, %c0_15], %15 {strides = array<i32>} : memref<16x128xf32, #tpu.memory_space<vmem>>, vector<16x128xf32>,
    } else {
    }
    return
  }
  func.func @transform_0(%arg0: i32, %arg1: i32, %arg2: i32) -> (i32, i32) {
    %c0_i32 = arith.constant 0 : i32
    return %arg0, %arg2 : i32, i32
  }
  func.func @transform_1(%arg0: i32, %arg1: i32, %arg2: i32) -> (i32, i32) {
    %c0_i32 = arith.constant 0 : i32
    return %arg2, %arg1 : i32, i32
  }
  func.func @transform_2(%arg0: i32, %arg1: i32, %arg2: i32) -> (i32, i32) {
    %c0_i32 = arith.constant 0 : i32
    %c0_i32_0 = arith.constant 0 : i32
    return %c0_i32, %arg1 : i32, i32
  }
  func.func @transform_3(%arg0: i32, %arg1: i32, %arg2: i32) -> (i32, i32) {
    %c0_i32 = arith.constant 0 : i32
    return %arg0, %arg1 : i32, i32
  }
}

module attributes {stable_mosaic.version = 11 : i64} {
  func.func @_matmul_kernel(%arg0: i32, %arg1: i32, %arg2: i32, %arg3: memref<16x128xbf16, #tpu.memory_space<vmem>>, %arg4: memref<128x128xbf16, #tpu.memory_space<vmem>>, %arg5: memref<1x128xf32, #tpu.memory_space<vmem>>, %arg6: memref<16x128xf32, #tpu.memory_space<vmem>>, %arg7: memref<16x128xf32, #tpu.memory_space<vmem>>) attributes {dimension_semantics = [#tpu.dimension_semantics<parallel>, #tpu.dimension_semantics<parallel>, #tpu.dimension_semantics<arbitrary>], iteration_bounds = array<i64: 1, 1, 1>, scalar_prefetch = 0 : i64, scratch_operands = 1 : i64, tpu.core_type = #tpu.core_type<tc>, window_params = [{transform_indices = @transform_0, window_bounds = array<i64: 16, 128>}, {transform_indices = @transform_1, window_bounds = array<i64: 128, 128>}, {transform_indices = @transform_2, window_bounds = array<i64: 1, 128>}, {transform_indices = @transform_3, window_bounds = array<i64: 16, 128>}]} {
    %c0_i32 = arith.constant 0 : i32
    %0 = arith.cmpi eq, %arg2, %c0_i32 : i32
    %1 = arith.extui %0 : i1 to i32
    %c0_i32_0 = arith.constant 0 : i32
    %2 = arith.cmpi ne, %1, %c0_i32_0 : i32
    scf.if %2 {
      %cst_10 = arith.constant 0.000000e+00 : f32
      %12 = vector.broadcast %cst_10 : f32 to vector<16x128xf32>
      %c0_11 = arith.constant 0 : index
      %c0_12 = arith.constant 0 : index
      %13 = vector.load %arg7[%c0_11, %c0_12] : memref<16x128xf32, #tpu.memory_space<vmem>>, vector<16x128xf32>
      tpu.vector_store %arg7[%c0_11, %c0_12], %12 {strides = array<i32>} : memref<16x128xf32, #tpu.memory_space<vmem>>, vector<16x128xf32>,
    } else {
    }
    %c0 = arith.constant 0 : index
    %c0_1 = arith.constant 0 : index
    %3 = vector.load %arg7[%c0, %c0_1] : memref<16x128xf32, #tpu.memory_space<vmem>>, vector<16x128xf32>
    %c0_2 = arith.constant 0 : index
    %c0_3 = arith.constant 0 : index
    %4 = vector.load %arg3[%c0_2, %c0_3] : memref<16x128xbf16, #tpu.memory_space<vmem>>, vector<16x128xbf16>
    %c0_4 = arith.constant 0 : index
    %c0_5 = arith.constant 0 : index
    %5 = vector.load %arg4[%c0_4, %c0_5] : memref<128x128xbf16, #tpu.memory_space<vmem>>, vector<128x128xbf16>
    %cst = arith.constant dense<0.000000e+00> : vector<16x128xf32>
    %6 = tpu.matmul %4, %5, %cst {dimension_numbers = #tpu.dot_dimension_numbers<[1], [0], [0], [1], [0, 0, 1, 1], [], []>} : vector<16x128xbf16>, vector<128x128xbf16>, vector<16x128xf32> -> vector<16x128xf32>
    %7 = arith.addf %3, %6 : vector<16x128xf32>
    %c0_6 = arith.constant 0 : index
    %c0_7 = arith.constant 0 : index
    %8 = vector.load %arg7[%c0_6, %c0_7] : memref<16x128xf32, #tpu.memory_space<vmem>>, vector<16x128xf32>
    tpu.vector_store %arg7[%c0_6, %c0_7], %7 {strides = array<i32>} : memref<16x128xf32, #tpu.memory_space<vmem>>, vector<16x128xf32>,
    %c0_i32_8 = arith.constant 0 : i32
    %9 = arith.cmpi eq, %arg2, %c0_i32_8 : i32
    %10 = arith.extui %9 : i1 to i32
    %c0_i32_9 = arith.constant 0 : i32
    %11 = arith.cmpi ne, %10, %c0_i32_9 : i32
    scf.if %11 {
      %c0_10 = arith.constant 0 : index
      %c0_11 = arith.constant 0 : index
      %12 = vector.load %arg7[%c0_10, %c0_11] : memref<16x128xf32, #tpu.memory_space<vmem>>, vector<16x128xf32>
      %c0_12 = arith.constant 0 : index
      %c0_13 = arith.constant 0 : index
      %13 = vector.load %arg5[%c0_12, %c0_13] : memref<1x128xf32, #tpu.memory_space<vmem>>, vector<1x128xf32>
      %14 = vector.broadcast %13 : vector<1x128xf32> to vector<16x128xf32>
      %15 = arith.addf %12, %14 : vector<16x128xf32>
      %c0_14 = arith.constant 0 : index
      %c0_15 = arith.constant 0 : index
      %16 = vector.load %arg6[%c0_14, %c0_15] : memref<16x128xf32, #tpu.memory_space<vmem>>, vector<16x128xf32>
      tpu.vector_store %arg6[%c0_14, %c0_15], %15 {strides = array<i32>} : memref<16x128xf32, #tpu.memory_space<vmem>>, vector<16x128xf32>,
    } else {
    }
    return
  }
  func.func @transform_0(%arg0: i32, %arg1: i32, %arg2: i32) -> (i32, i32) {
    %c0_i32 = arith.constant 0 : i32
    return %arg0, %arg2 : i32, i32
  }
  func.func @transform_1(%arg0: i32, %arg1: i32, %arg2: i32) -> (i32, i32) {
    %c0_i32 = arith.constant 0 : i32
    return %arg2, %arg1 : i32, i32
  }
  func.func @transform_2(%arg0: i32, %arg1: i32, %arg2: i32) -> (i32, i32) {
    %c0_i32 = arith.constant 0 : i32
    %c0_i32_0 = arith.constant 0 : i32
    return %c0_i32, %arg1 : i32, i32
  }
  func.func @transform_3(%arg0: i32, %arg1: i32, %arg2: i32) -> (i32, i32) {
    %c0_i32 = arith.constant 0 : i32
    return %arg0, %arg1 : i32, i32
  }
}

module attributes {stable_mosaic.version = 11 : i64} {
  func.func @_lstm_stack_kernel(%arg0: i32, %arg1: memref<1x2x128xf32, #tpu.memory_space<vmem>>, %arg2: memref<2x32x128xbf16, #tpu.memory_space<vmem>>, %arg3: memref<1x32x128xbf16, #tpu.memory_space<vmem>>, %arg4: memref<1x1x128xf32, #tpu.memory_space<vmem>>, %arg5: memref<1x2x32xf32, #tpu.memory_space<vmem>>, %arg6: memref<2x2x32xf32, #tpu.memory_space<vmem>>, %arg7: memref<2x2x32xf32, #tpu.memory_space<vmem>>) attributes {dimension_semantics = [#tpu.dimension_semantics<arbitrary>], iteration_bounds = array<i64: 8>, scalar_prefetch = 0 : i64, scratch_operands = 2 : i64, tpu.core_type = #tpu.core_type<tc>, window_params = [{transform_indices = @transform_0, window_bounds = array<i64: 1, 2, 128>}, {pipeline_mode = #tpu.pipeline_mode<synchronous>, transform_indices = @transform_1, window_bounds = array<i64: 2, 32, 128>}, {pipeline_mode = #tpu.pipeline_mode<synchronous>, transform_indices = @transform_2, window_bounds = array<i64: 1, 32, 128>}, {pipeline_mode = #tpu.pipeline_mode<synchronous>, transform_indices = @transform_3, window_bounds = array<i64: 1, 1, 128>}, {transform_indices = @transform_4, window_bounds = array<i64: 1, 2, 32>}]} {
    %c0_i32 = arith.constant 0 : i32
    %0 = arith.cmpi eq, %arg0, %c0_i32 : i32
    %1 = arith.extui %0 : i1 to i32
    %c0_i32_0 = arith.constant 0 : i32
    %2 = arith.cmpi ne, %1, %c0_i32_0 : i32
    scf.if %2 {
      %cst_49 = arith.constant 0.000000e+00 : f32
      %96 = vector.broadcast %cst_49 : f32 to vector<2x2x32xf32>
      %c0_50 = arith.constant 0 : index
      %c0_51 = arith.constant 0 : index
      %c0_52 = arith.constant 0 : index
      %97 = vector.load %arg6[%c0_50, %c0_51, %c0_52] : memref<2x2x32xf32, #tpu.memory_space<vmem>>, vector<2x2x32xf32>
      tpu.vector_store %arg6[%c0_50, %c0_51, %c0_52], %96 {strides = array<i32>} : memref<2x2x32xf32, #tpu.memory_space<vmem>>, vector<2x2x32xf32>,
      %cst_53 = arith.constant 0.000000e+00 : f32
      %98 = vector.broadcast %cst_53 : f32 to vector<2x2x32xf32>
      %c0_54 = arith.constant 0 : index
      %c0_55 = arith.constant 0 : index
      %c0_56 = arith.constant 0 : index
      %99 = vector.load %arg7[%c0_54, %c0_55, %c0_56] : memref<2x2x32xf32, #tpu.memory_space<vmem>>, vector<2x2x32xf32>
      tpu.vector_store %arg7[%c0_54, %c0_55, %c0_56], %98 {strides = array<i32>} : memref<2x2x32xf32, #tpu.memory_space<vmem>>, vector<2x2x32xf32>,
    } else {
    }
    %c0 = arith.constant 0 : index
    %c0_1 = arith.constant 0 : index
    %c0_2 = arith.constant 0 : index
    %3 = vector.load %arg6[%c0, %c0_1, %c0_2] : memref<2x2x32xf32, #tpu.memory_space<vmem>>, vector<1x2x32xf32>
    %4 = vector.shape_cast %3 : vector<1x2x32xf32> to vector<2x32xf32>
    %c0_3 = arith.constant 0 : index
    %c0_4 = arith.constant 0 : index
    %c0_5 = arith.constant 0 : index
    %5 = vector.load %arg7[%c0_3, %c0_4, %c0_5] : memref<2x2x32xf32, #tpu.memory_space<vmem>>, vector<1x2x32xf32>
    %6 = vector.shape_cast %5 : vector<1x2x32xf32> to vector<2x32xf32>
    %7 = arith.truncf %4 : vector<2x32xf32> to vector<2x32xbf16>
    %c0_6 = arith.constant 0 : index
    %c0_7 = arith.constant 0 : index
    %c0_8 = arith.constant 0 : index
    %8 = vector.load %arg2[%c0_6, %c0_7, %c0_8] : memref<2x32x128xbf16, #tpu.memory_space<vmem>>, vector<1x32x128xbf16>
    %9 = vector.shape_cast %8 : vector<1x32x128xbf16> to vector<32x128xbf16>
    %cst = arith.constant dense<0.000000e+00> : vector<2x128xf32>
    %10 = tpu.matmul %7, %9, %cst {dimension_numbers = #tpu.dot_dimension_numbers<[1], [0], [0], [1], [0, 0, 1, 1], [], []>} : vector<2x32xbf16>, vector<32x128xbf16>, vector<2x128xf32> -> vector<2x128xf32>
    %c0_9 = arith.constant 0 : index
    %c0_10 = arith.constant 0 : index
    %c0_11 = arith.constant 0 : index
    %11 = vector.load %arg1[%c0_9, %c0_10, %c0_11] : memref<1x2x128xf32, #tpu.memory_space<vmem>>, vector<1x2x128xf32>
    %12 = vector.shape_cast %11 : vector<1x2x128xf32> to vector<2x128xf32>
    %13 = arith.addf %12, %10 : vector<2x128xf32>
    %14 = vector.extract_strided_slice %13 {offsets = [0, 0], sizes = [2, 32], strides = [1, 1]} : vector<2x128xf32> to vector<2x32xf32>
    %15 = arith.negf %14 : vector<2x32xf32>
    %16 = math.exp %15 : vector<2x32xf32>
    %cst_12 = arith.constant 1.000000e+00 : f32
    %17 = vector.broadcast %cst_12 : f32 to vector<2x32xf32>
    %18 = arith.addf %17, %16 : vector<2x32xf32>
    %19 = arith.divf %17, %18 : vector<2x32xf32>
    %20 = vector.extract_strided_slice %13 {offsets = [0, 32], sizes = [2, 32], strides = [1, 1]} : vector<2x128xf32> to vector<2x32xf32>
    %21 = arith.negf %20 : vector<2x32xf32>
    %22 = math.exp %21 : vector<2x32xf32>
    %cst_13 = arith.constant 1.000000e+00 : f32
    %23 = vector.broadcast %cst_13 : f32 to vector<2x32xf32>
    %24 = arith.addf %23, %22 : vector<2x32xf32>
    %25 = arith.divf %23, %24 : vector<2x32xf32>
    %26 = vector.extract_strided_slice %13 {offsets = [0, 64], sizes = [2, 32], strides = [1, 1]} : vector<2x128xf32> to vector<2x32xf32>
    %27 = math.tanh %26 : vector<2x32xf32>
    %28 = vector.extract_strided_slice %13 {offsets = [0, 96], sizes = [2, 32], strides = [1, 1]} : vector<2x128xf32> to vector<2x32xf32>
    %29 = arith.negf %28 : vector<2x32xf32>
    %30 = math.exp %29 : vector<2x32xf32>
    %cst_14 = arith.constant 1.000000e+00 : f32
    %31 = vector.broadcast %cst_14 : f32 to vector<2x32xf32>
    %32 = arith.addf %31, %30 : vector<2x32xf32>
    %33 = arith.divf %31, %32 : vector<2x32xf32>
    %34 = arith.mulf %25, %6 : vector<2x32xf32>
    %35 = arith.mulf %19, %27 : vector<2x32xf32>
    %36 = arith.addf %34, %35 : vector<2x32xf32>
    %37 = math.tanh %36 : vector<2x32xf32>
    %38 = arith.mulf %33, %37 : vector<2x32xf32>
    %c0_15 = arith.constant 0 : index
    %c0_16 = arith.constant 0 : index
    %c0_17 = arith.constant 0 : index
    %39 = vector.load %arg6[%c0_15, %c0_16, %c0_17] : memref<2x2x32xf32, #tpu.memory_space<vmem>>, vector<1x2x32xf32>
    %40 = vector.shape_cast %39 : vector<1x2x32xf32> to vector<2x32xf32>
    %41 = vector.shape_cast %38 : vector<2x32xf32> to vector<1x2x32xf32>
    tpu.vector_store %arg6[%c0_15, %c0_16, %c0_17], %41 {strides = array<i32>} : memref<2x2x32xf32, #tpu.memory_space<vmem>>, vector<1x2x32xf32>,
    %c0_18 = arith.constant 0 : index
    %c0_19 = arith.constant 0 : index
    %c0_20 = arith.constant 0 : index
    %42 = vector.load %arg7[%c0_18, %c0_19, %c0_20] : memref<2x2x32xf32, #tpu.memory_space<vmem>>, vector<1x2x32xf32>
    %43 = vector.shape_cast %42 : vector<1x2x32xf32> to vector<2x32xf32>
    %44 = vector.shape_cast %36 : vector<2x32xf32> to vector<1x2x32xf32>
    tpu.vector_store %arg7[%c0_18, %c0_19, %c0_20], %44 {strides = array<i32>} : memref<2x2x32xf32, #tpu.memory_space<vmem>>, vector<1x2x32xf32>,
    %c1 = arith.constant 1 : index
    %c0_21 = arith.constant 0 : index
    %c0_22 = arith.constant 0 : index
    %45 = vector.load %arg6[%c1, %c0_21, %c0_22] : memref<2x2x32xf32, #tpu.memory_space<vmem>>, vector<1x2x32xf32>
    %46 = vector.shape_cast %45 : vector<1x2x32xf32> to vector<2x32xf32>
    %c1_23 = arith.constant 1 : index
    %c0_24 = arith.constant 0 : index
    %c0_25 = arith.constant 0 : index
    %47 = vector.load %arg7[%c1_23, %c0_24, %c0_25] : memref<2x2x32xf32, #tpu.memory_space<vmem>>, vector<1x2x32xf32>
    %48 = vector.shape_cast %47 : vector<1x2x32xf32> to vector<2x32xf32>
    %49 = arith.truncf %46 : vector<2x32xf32> to vector<2x32xbf16>
    %c1_26 = arith.constant 1 : index
    %c0_27 = arith.constant 0 : index
    %c0_28 = arith.constant 0 : index
    %50 = vector.load %arg2[%c1_26, %c0_27, %c0_28] : memref<2x32x128xbf16, #tpu.memory_space<vmem>>, vector<1x32x128xbf16>
    %51 = vector.shape_cast %50 : vector<1x32x128xbf16> to vector<32x128xbf16>
    %cst_29 = arith.constant dense<0.000000e+00> : vector<2x128xf32>
    %52 = tpu.matmul %49, %51, %cst_29 {dimension_numbers = #tpu.dot_dimension_numbers<[1], [0], [0], [1], [0, 0, 1, 1], [], []>} : vector<2x32xbf16>, vector<32x128xbf16>, vector<2x128xf32> -> vector<2x128xf32>
    %53 = arith.truncf %38 : vector<2x32xf32> to vector<2x32xbf16>
    %c0_30 = arith.constant 0 : index
    %c0_31 = arith.constant 0 : index
    %c0_32 = arith.constant 0 : index
    %54 = vector.load %arg3[%c0_30, %c0_31, %c0_32] : memref<1x32x128xbf16, #tpu.memory_space<vmem>>, vector<1x32x128xbf16>
    %55 = vector.shape_cast %54 : vector<1x32x128xbf16> to vector<32x128xbf16>
    %cst_33 = arith.constant dense<0.000000e+00> : vector<2x128xf32>
    %56 = tpu.matmul %53, %55, %cst_33 {dimension_numbers = #tpu.dot_dimension_numbers<[1], [0], [0], [1], [0, 0, 1, 1], [], []>} : vector<2x32xbf16>, vector<32x128xbf16>, vector<2x128xf32> -> vector<2x128xf32>
    %57 = arith.addf %56, %52 : vector<2x128xf32>
    %c0_34 = arith.constant 0 : index
    %c0_35 = arith.constant 0 : index
    %c0_36 = arith.constant 0 : index
    %58 = vector.load %arg4[%c0_34, %c0_35, %c0_36] : memref<1x1x128xf32, #tpu.memory_space<vmem>>, vector<1x1x128xf32>
    %59 = vector.shape_cast %58 : vector<1x1x128xf32> to vector<1x128xf32>
    %60 = vector.broadcast %59 : vector<1x128xf32> to vector<2x128xf32>
    %61 = arith.addf %57, %60 : vector<2x128xf32>
    %62 = vector.extract_strided_slice %61 {offsets = [0, 0], sizes = [2, 32], strides = [1, 1]} : vector<2x128xf32> to vector<2x32xf32>
    %63 = arith.negf %62 : vector<2x32xf32>
    %64 = math.exp %63 : vector<2x32xf32>
    %cst_37 = arith.constant 1.000000e+00 : f32
    %65 = vector.broadcast %cst_37 : f32 to vector<2x32xf32>
    %66 = arith.addf %65, %64 : vector<2x32xf32>
    %67 = arith.divf %65, %66 : vector<2x32xf32>
    %68 = vector.extract_strided_slice %61 {offsets = [0, 32], sizes = [2, 32], strides = [1, 1]} : vector<2x128xf32> to vector<2x32xf32>
    %69 = arith.negf %68 : vector<2x32xf32>
    %70 = math.exp %69 : vector<2x32xf32>
    %cst_38 = arith.constant 1.000000e+00 : f32
    %71 = vector.broadcast %cst_38 : f32 to vector<2x32xf32>
    %72 = arith.addf %71, %70 : vector<2x32xf32>
    %73 = arith.divf %71, %72 : vector<2x32xf32>
    %74 = vector.extract_strided_slice %61 {offsets = [0, 64], sizes = [2, 32], strides = [1, 1]} : vector<2x128xf32> to vector<2x32xf32>
    %75 = math.tanh %74 : vector<2x32xf32>
    %76 = vector.extract_strided_slice %61 {offsets = [0, 96], sizes = [2, 32], strides = [1, 1]} : vector<2x128xf32> to vector<2x32xf32>
    %77 = arith.negf %76 : vector<2x32xf32>
    %78 = math.exp %77 : vector<2x32xf32>
    %cst_39 = arith.constant 1.000000e+00 : f32
    %79 = vector.broadcast %cst_39 : f32 to vector<2x32xf32>
    %80 = arith.addf %79, %78 : vector<2x32xf32>
    %81 = arith.divf %79, %80 : vector<2x32xf32>
    %82 = arith.mulf %73, %48 : vector<2x32xf32>
    %83 = arith.mulf %67, %75 : vector<2x32xf32>
    %84 = arith.addf %82, %83 : vector<2x32xf32>
    %85 = math.tanh %84 : vector<2x32xf32>
    %86 = arith.mulf %81, %85 : vector<2x32xf32>
    %c1_40 = arith.constant 1 : index
    %c0_41 = arith.constant 0 : index
    %c0_42 = arith.constant 0 : index
    %87 = vector.load %arg6[%c1_40, %c0_41, %c0_42] : memref<2x2x32xf32, #tpu.memory_space<vmem>>, vector<1x2x32xf32>
    %88 = vector.shape_cast %87 : vector<1x2x32xf32> to vector<2x32xf32>
    %89 = vector.shape_cast %86 : vector<2x32xf32> to vector<1x2x32xf32>
    tpu.vector_store %arg6[%c1_40, %c0_41, %c0_42], %89 {strides = array<i32>} : memref<2x2x32xf32, #tpu.memory_space<vmem>>, vector<1x2x32xf32>,
    %c1_43 = arith.constant 1 : index
    %c0_44 = arith.constant 0 : index
    %c0_45 = arith.constant 0 : index
    %90 = vector.load %arg7[%c1_43, %c0_44, %c0_45] : memref<2x2x32xf32, #tpu.memory_space<vmem>>, vector<1x2x32xf32>
    %91 = vector.shape_cast %90 : vector<1x2x32xf32> to vector<2x32xf32>
    %92 = vector.shape_cast %84 : vector<2x32xf32> to vector<1x2x32xf32>
    tpu.vector_store %arg7[%c1_43, %c0_44, %c0_45], %92 {strides = array<i32>} : memref<2x2x32xf32, #tpu.memory_space<vmem>>, vector<1x2x32xf32>,
    %c0_46 = arith.constant 0 : index
    %c0_47 = arith.constant 0 : index
    %c0_48 = arith.constant 0 : index
    %93 = vector.load %arg5[%c0_46, %c0_47, %c0_48] : memref<1x2x32xf32, #tpu.memory_space<vmem>>, vector<1x2x32xf32>
    %94 = vector.shape_cast %93 : vector<1x2x32xf32> to vector<2x32xf32>
    %95 = vector.shape_cast %86 : vector<2x32xf32> to vector<1x2x32xf32>
    tpu.vector_store %arg5[%c0_46, %c0_47, %c0_48], %95 {strides = array<i32>} : memref<1x2x32xf32, #tpu.memory_space<vmem>>, vector<1x2x32xf32>,
    return
  }
  func.func @transform_0(%arg0: i32) -> (i32, i32, i32) {
    %c0_i32 = arith.constant 0 : i32
    %c0_i32_0 = arith.constant 0 : i32
    %c0_i32_1 = arith.constant 0 : i32
    return %arg0, %c0_i32, %c0_i32_0 : i32, i32, i32
  }
  func.func @transform_1(%arg0: i32) -> (i32, i32, i32) {
    %c0_i32 = arith.constant 0 : i32
    %c0_i32_0 = arith.constant 0 : i32
    %c0_i32_1 = arith.constant 0 : i32
    %c0_i32_2 = arith.constant 0 : i32
    return %c0_i32, %c0_i32_0, %c0_i32_1 : i32, i32, i32
  }
  func.func @transform_2(%arg0: i32) -> (i32, i32, i32) {
    %c0_i32 = arith.constant 0 : i32
    %c0_i32_0 = arith.constant 0 : i32
    %c0_i32_1 = arith.constant 0 : i32
    %c0_i32_2 = arith.constant 0 : i32
    return %c0_i32, %c0_i32_0, %c0_i32_1 : i32, i32, i32
  }
  func.func @transform_3(%arg0: i32) -> (i32, i32, i32) {
    %c0_i32 = arith.constant 0 : i32
    %c0_i32_0 = arith.constant 0 : i32
    %c0_i32_1 = arith.constant 0 : i32
    %c0_i32_2 = arith.constant 0 : i32
    return %c0_i32, %c0_i32_0, %c0_i32_1 : i32, i32, i32
  }
  func.func @transform_4(%arg0: i32) -> (i32, i32, i32) {
    %c0_i32 = arith.constant 0 : i32
    %c0_i32_0 = arith.constant 0 : i32
    %c0_i32_1 = arith.constant 0 : i32
    return %arg0, %c0_i32, %c0_i32_0 : i32, i32, i32
  }
}

</mosaic_0001>

<bundles_post_ra>
// kernel: model_forward.5
= control target key start
LH: loop header
LB: loop body
LE: loop exit
PB: predicated region body
PF: predicated region fallthrough
CT: control target
= control target key end

     0   :  { %v210_v0 = vmov 0.0   ;;  %vm211_vm0 = vmmov 0   ;;  %s268_s1 = inlined_call_operand.vmem [shape: bf16[128,128], index: 1, kind: input, shape index: {}]   ;;  %s269_s0 = inlined_call_operand.vmem [shape: bf16[16,128], index: 0, kind: input, shape index: {}]   ;;  %s270_s2 = inlined_call_operand.vmem [shape: f32[1,128], index: 2, kind: input, shape index: {}]   ;;  %s271_s3 = inlined_call_operand.vmem [shape: f32[16,128], index: 3, kind: output, shape index: {}]  }
   0x1   :  { %179 = vmatprep.subr.bf16.mxu0 %v210_v0  ;;  %v201_v1 = vld [vmem:[%s268_s1 + $0x38] sm:$0xff]   ;;  %195 = vmatprep.mubr.msk.bf16.mxu0 %vm211_vm0, %v210_v0  ;;  %v202_v2 = vld [vmem:[%s268_s1 + $0x30] sm:$0xff]   ;;  %v203_v3 = vld [vmem:[%s268_s1 + $0x28] sm:$0xff]  }
   0x2   :  { %180 = vmatpush3.bf16.msra.mxu0 %v201_v1  ;;  %v204_v4 = vld [vmem:[%s268_s1 + $0x20] sm:$0xff]   ;;  %v205_v5 = vld [vmem:[%s268_s1 + $0x18] sm:$0xff]   ;;  %v206_v6 = vld [vmem:[%s268_s1 + $0x10] sm:$0xff]  }
   0x3   :  { %181 = vmatprep.subr.bf16.mxu0 %v210_v0  ;;  %v207_v7 = vld [vmem:[%s268_s1 + $0x8] sm:$0xff]   ;;  %v208_v8 = vld [vmem:[%s268_s1] sm:$0xff]  }
   0x4   :  { %v209_v9 = vld [vmem:[%s269_s0] sm:$0xff]  }
   0x5   :  { %v169_v10 = vld [vmem:[%s270_s2] ss:$0 sm:$0xff] }
   0x6   :  { %182 = vmatpush3.bf16.msra.mxu0 %v202_v2 }
   0x7   :  { %183 = vmatprep.subr.bf16.mxu0 %v210_v0 }
   0xa   :  { %184 = vmatpush3.bf16.msra.mxu0 %v203_v3 }
   0xb   :  { %185 = vmatprep.subr.bf16.mxu0 %v210_v0 }
   0xe   :  { %186 = vmatpush3.bf16.msra.mxu0 %v204_v4 }
   0xf   :  { %187 = vmatprep.subr.bf16.mxu0 %v210_v0 }
  0x12   :  { %188 = vmatpush3.bf16.msra.mxu0 %v205_v5 }
  0x13   :  { %189 = vmatprep.subr.bf16.mxu0 %v210_v0 }
  0x16   :  { %190 = vmatpush3.bf16.msra.mxu0 %v206_v6 }
  0x17   :  { %191 = vmatprep.subr.bf16.mxu0 %v210_v0 }
  0x1a   :  { %192 = vmatpush3.bf16.msra.mxu0 %v207_v7 }
  0x1b   :  { %193 = vmatprep.subr.bf16.mxu0 %v210_v0 }
  0x1e   :  { %194 = vmatpush3.bf16.msra.mxu0 %v208_v8 }
  0x21   :  { %196 = vmatmul.mubr.bf16.vlgmr.msra.gmra.mxu0 %v209_v9 }
  0xe1   :  { %v129_v11 = vpop.f32.mrf.mxu0 }
  0xe2   :  { %v152_v12 = vadd.f32 %v169_v10, %v129_v11 }
  0xe3   :  { %v197_v13 = vpop.f32.mrf.mxu0 }
  0xe4   :  { %154 = vst [vmem:[%s271_s3] sm:$0xff] %v152_v12 }
  0xe5   :  { %v132_v14 = vpop.f32.mrf.mxu0 }
  0xe6   :  { %v153_v15 = vadd.f32 %v169_v10, %v132_v14 }
  0xe7   :  { %v198_v16 = vpop.f32.mrf.mxu0 }
  0xe8   :  { %155 = vst [vmem:[%s271_s3 + $0x8] sm:$0xff] %v153_v15 }

// kernel: model_forward.7
= control target key start
LH: loop header
LB: loop body
LE: loop exit
PB: predicated region body
PF: predicated region fallthrough
CT: control target
= control target key end

     0   :  { %v248_v1 = vmov 0.0   ;;  %vm249_vm0 = vmmov 0   ;;  %s306_s0 = inlined_call_operand.vmem [shape: bf16[16,128], index: 0, kind: input, shape index: {}]   ;;  %s307_s1 = inlined_call_operand.vmem [shape: bf16[128,128], index: 1, kind: input, shape index: {}]   ;;  %s308_s2 = inlined_call_operand.vmem [shape: f32[1,128], index: 2, kind: input, shape index: {}]   ;;  %s309_s3 = inlined_call_operand.hbm [shape: f32[16,128], index: 3, kind: output, shape index: {}]  }
   0x1   :  { %v217_v0 = vld [vmem:[%s307_s1 + $0x38] sm:$0xff]   ;;  %192 = vmatprep.subr.bf16.mxu0 %v248_v1  ;;  %v218_v2 = vld [vmem:[%s307_s1 + $0x30] sm:$0xff]   ;;  %208 = vmatprep.mubr.msk.bf16.mxu0 %vm249_vm0, %v248_v1  ;;  %v219_v3 = vld [vmem:[%s307_s1 + $0x28] sm:$0xff]  }
   0x2   :  { %193 = vmatpush3.bf16.msra.mxu0 %v217_v0 }
   0x3   :  { %194 = vmatprep.subr.bf16.mxu0 %v248_v1 }
   0x6   :  { %195 = vmatpush3.bf16.msra.mxu0 %v218_v2 }
   0x7   :  { %196 = vmatprep.subr.bf16.mxu0 %v248_v1 }
   0x8   :  { %8 = vsyncpa [#allocation4], 0  ;;  %v220_v4 = vld [vmem:[%s307_s1 + $0x20] sm:$0xff]   ;;  %v221_v5 = vld [vmem:[%s307_s1 + $0x18] sm:$0xff]   ;;  %s250_s5 = smov [#allocation3]  }
   0x9   :  { %v222_v6 = vld [vmem:[%s307_s1 + $0x10] sm:$0xff]   ;;  %v223_v7 = vld [vmem:[%s307_s1 + $0x8] sm:$0xff]   ;;  %v224_v8 = vld [vmem:[%s307_s1] sm:$0xff]   ;;  %s162_s6 = sshll.u32 %s250_s5, 4  ;;  %s163_s6 = int_to_ptr.vmem [resolvable:$true] %s162_s6 }
   0xa   :  { %197 = vmatpush3.bf16.msra.mxu0 %v219_v3  ;;  %v225_v9 = vld [vmem:[%s306_s0] sm:$0xff]   ;;  %s226_s1 = scalar_lea.vmem %s163_s6, 256  ;;  %p231_p1 = scmp.lt.s32.totalorder %s163_s6, %s163_s6 }
   0xb   :  { %198 = vmatprep.subr.bf16.mxu0 %v248_v1  ;;  %v182_v10 = vld [vmem:[%s308_s2] ss:$0 sm:$0xff]  ;;  %p227_p0 = scmp.ne.s32.totalorder %s163_s6, %s226_s1  ;;  %p232_p2 = scmp.lt.s32.totalorder %s226_s1, %s226_s1 }
   0xd   :  { %p233_p3 = por %p232_p2, %p231_p1 }
   0xe   :  { %199 = vmatpush3.bf16.msra.mxu0 %v220_v4 }
   0xf   :  { %200 = vmatprep.subr.bf16.mxu0 %v248_v1  ;;  %p234_p4 = pnand %p233_p3, %p227_p0 }
  0x12   :  { %201 = vmatpush3.bf16.msra.mxu0 %v221_v5 }
  0x13   :  { %202 = vmatprep.subr.bf16.mxu0 %v248_v1 }
  0x16   :  { %203 = vmatpush3.bf16.msra.mxu0 %v222_v6 }
  0x17   :  { %204 = vmatprep.subr.bf16.mxu0 %v248_v1 }
  0x1a   :  { %205 = vmatpush3.bf16.msra.mxu0 %v223_v7 }
  0x1b   :  { %206 = vmatprep.subr.bf16.mxu0 %v248_v1 }
  0x1e   :  { %207 = vmatpush3.bf16.msra.mxu0 %v224_v8 }
  0x21   :  { %209 = vmatmul.mubr.bf16.vlgmr.msra.gmra.mxu0 %v225_v9 }
  0xe1   :  { %v130_v11 = vpop.f32.mrf.mxu0 }
  0xe2   :  { %v153_v12 = vadd.f32 %v182_v10, %v130_v11 }
  0xe3   :  { %v210_v13 = vpop.f32.mrf.mxu0 }
  0xe4   :  { %155 = vst [vmem:[#allocation3] sm:$0xff] %v153_v12 }
  0xe5   :  { %v133_v14 = vpop.f32.mrf.mxu0 }
  0xe6   :  { %v154_v15 = vadd.f32 %v182_v10, %v133_v14 }
  0xe7   :  { %v211_v16 = vpop.f32.mrf.mxu0 }
  0xe8   :  { %156 = vst [vmem:[#allocation3 + $0x8] sm:$0xff] %v154_v15 }
  0xe9   :  { %237 = shalt.err (!%p234_p4)
}
  0xea   :  { %s251_s0 = smov 128   ;;  %s252_s2 = smov 8  }
  0xeb   :  { %168 = dma.vmem_to_hbm [thread:$0]  %s163_s6, 256, %s309_s3, [#allocation4], %s251_s0, %s251_s0, %s252_s2  }
  0xec   :  { %246 = dma.done.wait [#allocation4], 256  }
  0xed   :  { %247 = vsyncadd [#allocation4], 4294967040 }
  0xee   :  { %172 = vsyncpa [#allocation4], 1 }

// kernel: model_forward.6
= control target key start
LH: loop header
LB: loop body
LE: loop exit
PB: predicated region body
PF: predicated region fallthrough
CT: control target
= control target key end

     0   :  { %s669_s15 = smov 0   ;;  %s729_s0 = inlined_call_operand.vmem [shape: f32[8,2,128], index: 0, kind: input, shape index: {}]   ;;  %s730_s1 = inlined_call_operand.vmem [shape: bf16[2,32,128], index: 1, kind: input, shape index: {}]   ;;  %s731_s2 = inlined_call_operand.vmem [shape: bf16[1,32,128], index: 2, kind: input, shape index: {}]   ;;  %s732_s3 = inlined_call_operand.vmem [shape: f32[1,1,128], index: 3, kind: input, shape index: {}]   ;;  %s733_s4 = inlined_call_operand.vmem [shape: f32[8,2,32], index: 4, kind: output, shape index: {}]  }
   0x1 LB: > { %s535_s16 = sadd.s32 4294967295, %s636_s15   ;;  %p539_p0 = scmp.ge.s32.totalorder %s636_s15, 1  ;;  %s636_s15 = sphi %s669_s15, %s14_s15  }
   0x2   : > { %p161_p1 = scmp.lt.s32.totalorder %s636_s15, 9 }
   0x4   : > { %p162_p2 = pnand %p539_p0, %p161_p1 }
   0x5   : > { %p185_p3 = scmp.lt.s32.totalorder (!%p162_p2), %s535_s16, 7  ;;  %p542_p4 = scmp.ne.s32.totalorder (!%p162_p2), %s535_s16, 0 }
   0x6   : > { %165 = sbr.rel (%p162_p2) target bundleno = 1412 (0x584), region = 36 }
   0xb   : > { %s186_s17 = scalar_select %p185_p3, %s535_s16, 7 }
   0xc   : > { %197 = sbr.rel (%p542_p4) target bundleno = 20 (0x14), region = 40 }
   0xd   : > { %s540_s18 = sshll.u32 %s186_s17, 1 }
   0xe   : > { %s188_s21 = scalar_lea.vmem %s729_s0, %s540_s18  ;;  %s683_s24 = scalar_lea.vmem %s733_s4, %s540_s18 }
  0x11   : > { %vm198_vm0 = vcmask 254976   ;;  %v638_v0 = vmov 0.0  }
  0x12   : > { %199 = vst.msk [vmem:[#allocation2] sm:$0x3] %vm198_vm0, %v638_v0  ;;  %200 = vst.msk [vmem:[#allocation2 + $0x2] sm:$0x3] %vm198_vm0, %v638_v0 }
  0x13   : > { %201 = vst.msk [vmem:[#allocation3] sm:$0x3] %vm198_vm0, %v638_v0  ;;  %202 = vst.msk [vmem:[#allocation3 + $0x2] sm:$0x3] %vm198_vm0, %v638_v0 }
  0x14 PF: > { %v608_v1 = vld [vmem:[%s730_s1 + $0x8] sm:$0xff]   ;;  %v639_v2 = vmov 0.0   ;;  %v609_v3 = vld [vmem:[%s730_s1] sm:$0xff]   ;;  %vm640_vm1 = vmmov 0   ;;  %vm222_vm2 = vcmask 261120   ;;  %s641_s29 = smov 64  }
  0x15   : > { %570 = vmatprep.subr.bf16.mxu0 %v639_v2  ;;  %578 = vmatprep.subr.bf16.mxu1 %v639_v2  ;;  %v266_v6 = vld [vmem:[%s188_s21] sm:$0x3]  ;;  %s642_s30 = smov 32   ;;  %v610_v24 = vld [vmem:[%s730_s1 + $0x18] sm:$0xff]   ;;  %v612_v25 = vld [vmem:[%s731_s2 + $0x8] sm:$0xff]   ;;  %vm300_vm3 = vcmask 254976  }
  0x16   : > { %571 = vmatpush3.bf16.msra.mxu0 %v608_v1  ;;  %574 = vmatprep.mubr.msk.bf16.mxu0 %vm640_vm1, %v639_v2  ;;  %v611_v26 = vld [vmem:[%s730_s1 + $0x10] sm:$0xff]   ;;  %v613_v28 = vld [vmem:[%s731_s2] sm:$0xff]   ;;  %s643_s16 = smov 96  }
  0x17   : > { %572 = vmatprep.subr.bf16.mxu0 %v639_v2  ;;  %582 = vmatprep.mubr.msk.bf16.mxu1 %vm640_vm1, %v639_v2  ;;  %v557_v41 = vld [vmem:[%s732_s3] ss:$0 sm:$0xff] }
  0x18   : > { %579 = vmatpush3.bf16.msra.mxu1 %v610_v24 }
  0x19   : > { %v203_v4 = vld [vmem:[#allocation2] sm:$0x3]  ;;  %v308_v27 = vld [vmem:[#allocation2 + $0x2] sm:$0x3]  ;;  %580 = vmatprep.subr.bf16.mxu1 %v639_v2 }
  0x1a   : > { %v205_v5 = vpack.c.bf16 %v203_v4, %v203_v4  ;;  %573 = vmatpush3.bf16.msra.mxu0 %v609_v3  ;;  %v204_v13 = vld [vmem:[#allocation3] sm:$0x3]  ;;  %v311_v29 = vpack.c.bf16 %v308_v27, %v308_v27  ;;  %v310_v34 = vld [vmem:[#allocation3 + $0x2] sm:$0x3] }
  0x1b   : > { %586 = vmatprep.subr.bf16.mxu0 %v639_v2 }
  0x1c   : > { %581 = vmatpush3.bf16.msra.mxu1 %v611_v26 }
  0x1d   : > { %575 = vmatmul.mubr.msk.bf16.vlgmr.msra.gmra.mxu0 %vm222_vm2, %v205_v5 }
  0x1e   : > { %590 = vmatprep.mubr.msk.bf16.mxu0 %vm640_vm1, %v639_v2  ;;  %587 = vmatpush3.bf16.msra.mxu0 %v612_v25 }
  0x1f   : > { %588 = vmatprep.subr.bf16.mxu0 %v639_v2  ;;  %583 = vmatmul.mubr.msk.bf16.vlgmr.msra.gmra.mxu1 %vm222_vm2, %v311_v29 }
  0x22   : > { %589 = vmatpush3.bf16.msra.mxu0 %v613_v28 }
  0xdd   : > { %v260_v7 = vpop.f32.mrf.mxu0 }
  0xde   : > { %v267_v8 = vadd.f32 %v266_v6, %v260_v7 }
  0xdf   : > { %v576_v9 = vpop.f32.mrf.mxu0  ;;  %v366_v35 = vpop.f32.mrf.mxu1 }
  0xe0   : > { %614 = vtanh.f32 %v267_v8  ;;  %v546_v14 = vmul.f32 -1.442695, %v267_v8 }
  0xe1   : > { %v263_v10 = vpop.f32.mrf.mxu0  ;;  %v584_v36 = vpop.f32.mrf.mxu1 }
  0xe2   : > { %616 = vpow2.f32 %v546_v14 }
  0xe3   : > { %v577_v11 = vpop.f32.mrf.mxu0  ;;  %v369_v37 = vpop.f32.mrf.mxu1 }
  0xe5   : > { %v585_v38 = vpop.f32.mrf.mxu1 }
  0xed   : > { %v615_v12 = vpop.eup %614 }
  0xee   : > { %281 = vrot.lane.b32.xlu0 %v615_v12, %s641_s29 }
  0xef   : > { %v617_v15 = vpop.eup %616 }
  0xf0   : > { %v271_v16 = vadd.f32 1.0, %v617_v15 }
  0xf2   : > { %276 = vrot.lane.b32.xlu0 %v204_v13, %s642_s30  ;;  %618 = vrcp.f32 %v271_v16 }
  0xff   : > { %v619_v17 = vpop.eup %618 }
 0x160   : > { %v282_v18 = vpop.permute.xlu0 %281 }
 0x161   : > { %v284_v19 = vmul.f32 %v619_v17, %v282_v18 }
 0x163   : > { %286 = vrot.lane.b32.xlu1 %v284_v19, %s642_s30 }
 0x164   : > { %v277_v20 = vpop.permute.xlu0 %276 }
 0x165   : > { %v279_v21 = vmul.f32 %v619_v17, %v277_v20 }
 0x1d5   : > { %v287_v22 = vpop.permute.xlu1 %286 }
 0x1d6   : > { %v289_v23 = vadd.f32 %v287_v22, %v279_v21 }
 0x1d8   : > { %620 = vtanh.f32 %v289_v23 }
 0x1e5   : > { %v621_v30 = vpop.eup %620 }
 0x1e6   : > { %292 = vrot.lane.b32.xlu1 %v621_v30, %s641_s29 }
 0x258   : > { %v293_v31 = vpop.permute.xlu1 %292 }
 0x259   : > { %v295_v32 = vmul.f32 %v619_v17, %v293_v31 }
 0x25b   : > { %v372_v33 = vpack.c.bf16 %v295_v32, %v295_v32 }
 0x25d   : > { %378 = vrot.lane.b32.xlu0 %v372_v33, %s642_s30 }
 0x261   : > { %451 = vrot.lane.b32.xlu0 %v310_v34, %s642_s30 }
 0x2cf   : > { %v379_v39 = vpop.permute.xlu0 %378 }
 0x2d0   : > { %591 = vmatmul.mubr.msk.bf16.vlgmr.msra.gmra.mxu0 %vm222_vm2, %v379_v39 }
 0x2d3   : > { %v452_v54 = vpop.permute.xlu0 %451 }
 0x390   : > { %v429_v40 = vpop.f32.mrf.mxu0 }
 0x391   : > { %v430_v42 = vadd.f32 %v429_v40, %v366_v35 }
 0x392   : > { %v592_v43 = vpop.f32.mrf.mxu0 }
 0x393   : > { %v442_v44 = vadd.f32 %v557_v41, %v430_v42 }
 0x394   : > { %v432_v45 = vpop.f32.mrf.mxu0 }
 0x395   : > { %622 = vtanh.f32 %v442_v44  ;;  %v558_v48 = vmul.f32 -1.442695, %v442_v44 }
 0x396   : > { %v593_v46 = vpop.f32.mrf.mxu0 }
 0x397   : > { %624 = vpow2.f32 %v558_v48 }
 0x3a2   : > { %v623_v47 = vpop.eup %622 }
 0x3a3   : > { %456 = vrot.lane.b32.xlu1 %v623_v47, %s641_s29 }
 0x3a4   : > { %v625_v49 = vpop.eup %624 }
 0x3a5   : > { %v446_v50 = vadd.f32 1.0, %v625_v49 }
 0x3a7   : > { %626 = vrcp.f32 %v446_v50 }
 0x3b4   : > { %v627_v51 = vpop.eup %626 }
 0x3b5   : > { %v454_v55 = vmul.f32 %v627_v51, %v452_v54 }
 0x415   : > { %v457_v52 = vpop.permute.xlu1 %456 }
 0x416   : > { %v459_v53 = vmul.f32 %v627_v51, %v457_v52 }
 0x418   : > { %461 = vrot.lane.b32.xlu1 %v459_v53, %s642_s30 }
 0x41c   : > { %297 = vrot.lane.b32.xlu1 %v295_v32, %s642_s30 }
 0x48a   : > { %v462_v56 = vpop.permute.xlu1 %461 }
 0x48b   : > { %v464_v57 = vadd.f32 %v462_v56, %v454_v55 }
 0x48d   : > { %628 = vtanh.f32 %v464_v57 }
 0x48e   : > { %v298_v58 = vpop.permute.xlu1 %297 }
 0x48f   : > { %301 = vst.msk [vmem:[#allocation2] sm:$0x3] %vm300_vm3, %v298_v58 }
 0x49a   : > { %v629_v59 = vpop.eup %628 }
 0x49b   : > { %467 = vrot.lane.b32.xlu0 %v629_v59, %s641_s29 }
 0x49f   : > { %303 = vrot.lane.b32.xlu0 %v289_v23, %s643_s16 }
 0x4a3   : > { %477 = vrot.lane.b32.xlu0 %v464_v57, %s643_s16 }
 0x50d   : > { %v468_v60 = vpop.permute.xlu0 %467 }
 0x50e   : > { %v470_v61 = vmul.f32 %v627_v51, %v468_v60 }
 0x510   : > { %472 = vrot.lane.b32.xlu1 %v470_v61, %s642_s30 }
 0x511   : > { %v304_v62 = vpop.permute.xlu0 %303 }
 0x512   : > { %306 = vst.msk [vmem:[#allocation3] sm:$0x3] %vm300_vm3, %v304_v62 }
 0x515   : > { %v478_v63 = vpop.permute.xlu0 %477 }
 0x516   : > { %480 = vst.msk [vmem:[#allocation3 + $0x2] sm:$0x3] %vm300_vm3, %v478_v63 }
 0x582   : > { %v473_v0 = vpop.permute.xlu1 %472 }
 0x583   : > { %475 = vst.msk [vmem:[#allocation2 + $0x2] sm:$0x3] %vm300_vm3, %v473_v0  ;;  %481 = vst.msk [vmem:[%s683_s24] sm:$0x3] %vm300_vm3, %v473_v0 }
 0x584 PF: > { %s14_s15 = sadd.s32 1, %s636_s15  }
 0x585   : > { %p11_p5 = scmp.ge.s32.totalorder %s14_s15, 10  }
 0x587   :  { %13 = sbr.rel (!%p11_p5) target bundleno = 1 (0x1), region = 73 }

// kernel: model_forward.4
= control target key start
LH: loop header
LB: loop body
LE: loop exit
PB: predicated region body
PF: predicated region fallthrough
CT: control target
= control target key end

     0   :  { %vm29_vm0 = vcmask 1042432   ;;  %v53_v10 = vlaneseq  ;;  %v2430_v12 = vmov 1983009808   ;;  %vm226_vm1 = vcmask 1040384   ;;  %s3000_s0 = inlined_call_operand.vmem [shape: f32[2,3,256], index: 0, kind: input, shape index: {}]   ;;  %s3001_s1 = inlined_call_operand.vmem [shape: bf16[3,2048], index: 1, kind: input, shape index: {}]   ;;  %s3002_s3 = inlined_call_operand.vmem [shape: bf16[2048,32], index: 3, kind: input, shape index: {}]   ;;  %s3003_s2 = inlined_call_operand.vmem [shape: f32[1,2048], index: 2, kind: input, shape index: {}]   ;;  %s3004_s4 = inlined_call_operand.vmem [shape: f32[1,32], index: 4, kind: input, shape index: {}]   ;;  %s3005_s5 = inlined_call_operand.vmem [shape: f32[2,32], index: 5, kind: output, shape index: {}]  }
   0x1   :  { %v21_v0 = vld [vmem:[%s3000_s0] sm:$0x77]  ;;  %v22_v1 = vld [vmem:[%s3000_s0 + $0x8] sm:$0x77]  ;;  %v156_v13 = vunpack.c.l.s4 %v2430_v12  ;;  %vm227_vm2 = vcmask 1041408   ;;  %v2431_v21 = vmov 65535  }
   0x2   :  { %v25_v2 = vcombine.high %v21_v0, %v21_v0  ;;  %v30_v3 = vsel %vm29_vm0, %v21_v0, 0.0  ;;  %v26_v4 = vcombine.high %v22_v1, %v22_v1  ;;  %v35_v6 = vsel %vm29_vm0, %v22_v1, 0.0  ;;  %v45_v15 = vld [vmem:[%s3001_s1] sm:$0xff]  ;;  %v46_v29 = vld [vmem:[%s3001_s1 + $0x8] sm:$0xff]  ;;  %v47_v40 = vld [vmem:[%s3001_s1 + $0x10] sm:$0xff] }
   0x3   :  { %v2469_v11 = vshrl.u32 %v53_v10, 7  ;;  %v157_v14 = vunpack.c.0.s8 %v156_v13  ;;  %v154_v17 = vcombine.high %v45_v15, %v45_v15  ;;  %v228_v22 = vsel %vm226_vm1, 4294967295, %v2431_v21  ;;  %v48_v50 = vld [vmem:[%s3001_s1 + $0x18] sm:$0xff]  ;;  %v2312_v21 = vld [vmem:[%s3002_s3 + $0x28] sm:$0xff]  }
   0x4   :  { %v31_v5 = vsel %vm29_vm0, %v25_v2, 0.0  ;;  %v36_v7 = vsel %vm29_vm0, %v26_v4, 0.0  ;;  %v2475_v24 = vsel %vm227_vm2, %v228_v22, 0  ;;  %v171_v30 = vcombine.high %v46_v29, %v46_v29  ;;  %v2303_v12 = vld [vmem:[%s3002_s3 + $0xf8] sm:$0xff]   ;;  %v2313_v22 = vld [vmem:[%s3002_s3 + $0xa8] sm:$0xff]  }
   0x5   :  { %v32_v8 = vadd.f32 %v31_v5, %v30_v3  ;;  %v37_v9 = vadd.f32 %v36_v7, %v35_v6  ;;  %v160_v16 = vsub.s32 %v157_v14, %v2469_v11  ;;  %v2432_v33 = vmov 0   ;;  %v2304_v13 = vld [vmem:[%s3002_s3 + $0x38] sm:$0xff]  }
   0x6   :  { %310 = vmatprep.mubr.bf16.mxu0 %v2432_v33  ;;  %351 = vmatprep.mubr.bf16.mxu1 %v2432_v33  ;;  %v188_v41 = vcombine.high %v47_v40, %v47_v40  ;;  %v205_v51 = vcombine.high %v48_v50, %v48_v50  ;;  %v138_v61 = vand.u32 127, %v53_v10  ;;  %vm147_vm3 = vcmask 1041409   ;;  %v2302_v10 = vld [vmem:[%s3002_s3 + $0x78] sm:$0xff]  }
   0x7   :  { %33 = vadd.xlane.f32.xlu0 %v32_v8  ;;  %v161_v18 = vrot.slane %v45_v15, %v160_v16  ;;  %v168_v19 = vrot.slane %v154_v17, %v160_v16  ;;  %v178_v31 = vrot.slane %v46_v29, %v160_v16  ;;  %v185_v32 = vrot.slane %v171_v30, %v160_v16  ;;  %v2305_v14 = vld [vmem:[%s3002_s3 + $0xb8] sm:$0xff]   ;;  %v2306_v15 = vld [vmem:[%s3002_s3 + $0x70] sm:$0xff]  }
   0x8   :  { %v195_v42 = vrot.slane %v47_v40, %v160_v16  ;;  %v202_v43 = vrot.slane %v188_v41, %v160_v16  ;;  %v212_v52 = vrot.slane %v48_v50, %v160_v16  ;;  %v219_v53 = vrot.slane %v205_v51, %v160_v16  ;;  %v2307_v16 = vld [vmem:[%s3002_s3 + $0xf0] sm:$0xff]   ;;  %v2320_v29 = vld [vmem:[%s3002_s3 + $0x18] sm:$0xff]   ;;  %v2331_v40 = vld [vmem:[%s3002_s3 + $0xc0] sm:$0xff]  }
   0x9   :  { %v169_v20 = vcombine.high %v161_v18, %v161_v18  ;;  %v170_v23 = vcombine.high %v168_v19, %v168_v19  ;;  %v231_v27 = vand.u32 %v2475_v24, %v161_v18  ;;  %v237_v28 = vand.u32 %v2475_v24, %v168_v19  ;;  %v2308_v17 = vld [vmem:[%s3002_s3 + $0x30] sm:$0xff]   ;;  %v2310_v19 = vld [vmem:[%s3002_s3 + $0x68] sm:$0xff]   ;;  %v2321_v30 = vld [vmem:[%s3002_s3 + $0x98] sm:$0xff]  }
   0xa   :  { %v186_v34 = vcombine.high %v178_v31, %v178_v31  ;;  %v187_v35 = vcombine.high %v185_v32, %v185_v32  ;;  %v243_v36 = vand.u32 %v2475_v24, %v178_v31  ;;  %v249_v37 = vand.u32 %v2475_v24, %v185_v32  ;;  %v2309_v18 = vld [vmem:[%s3002_s3 + $0xb0] sm:$0xff]   ;;  %v2332_v41 = vld [vmem:[%s3002_s3] sm:$0xff]  }
   0xb   :  { %38 = vadd.xlane.f32.xlu0 %v37_v9  ;;  %v234_v25 = vand.u32 %v2475_v24, %v169_v20  ;;  %v240_v26 = vand.u32 %v2475_v24, %v170_v23  ;;  %v203_v44 = vcombine.high %v195_v42, %v195_v42  ;;  %v204_v45 = vcombine.high %v202_v43, %v202_v43  ;;  %v2311_v20 = vld [vmem:[%s3002_s3 + $0xe8] sm:$0xff]   ;;  %v2314_v23 = vld [vmem:[%s3002_s3 + $0x60] sm:$0xff]   ;;  %v2322_v31 = vld [vmem:[%s3002_s3 + $0x50] sm:$0xff]  }
   0xc   :  { %v246_v38 = vand.u32 %v2475_v24, %v186_v34  ;;  %v252_v39 = vand.u32 %v2475_v24, %v187_v35  ;;  %v255_v46 = vand.u32 %v2475_v24, %v195_v42  ;;  %v261_v47 = vand.u32 %v2475_v24, %v202_v43  ;;  %v2323_v32 = vld [vmem:[%s3002_s3 + $0xd0] sm:$0xff]   ;;  %v2326_v35 = vld [vmem:[%s3002_s3 + $0x48] sm:$0xff]   ;;  %v2333_v42 = vld [vmem:[%s3002_s3 + $0x80] sm:$0xff]  }
   0xd   :  { %292 = vmatprep.subr.bf16.mxu0 %v234_v25  ;;  %333 = vmatprep.subr.bf16.mxu1 %v240_v26  ;;  %v258_v48 = vand.u32 %v2475_v24, %v203_v44  ;;  %v264_v49 = vand.u32 %v2475_v24, %v204_v45  ;;  %v220_v54 = vcombine.high %v212_v52, %v212_v52  ;;  %vm222_vm4 = vcmask 23552   ;;  %v2316_v25 = vld [vmem:[%s3002_s3 + $0x20] sm:$0xff]   ;;  %v2325_v34 = vld [vmem:[%s3002_s3 + $0x90] sm:$0xff]   ;;  %v2334_v43 = vld [vmem:[%s3002_s3 + $0x178] sm:$0xff]  }
   0xe   :  { %293 = vmatpush1.bf16.msra.mxu0 %v231_v27  ;;  %334 = vmatpush1.bf16.msra.mxu1 %v237_v28  ;;  %v221_v55 = vcombine.high %v219_v53, %v219_v53  ;;  %v267_v56 = vand.u32 %v2475_v24, %v212_v52  ;;  %v273_v57 = vand.u32 %v2475_v24, %v219_v53  ;;  %v2317_v26 = vld [vmem:[%s3002_s3 + $0xa0] sm:$0xff]   ;;  %v2318_v27 = vld [vmem:[%s3002_s3 + $0x58] sm:$0xff]   ;;  %v79_v45 = vsub.s32 6, %v2469_v11 }
   0xf   :  { %374 = vmatprep.subr.bf16.mxu0 %v246_v38  ;;  %415 = vmatprep.subr.bf16.mxu1 %v252_v39  ;;  %v270_v58 = vand.u32 %v2475_v24, %v220_v54  ;;  %v141_v2 = vsub.s32 %v138_v61, %v2469_v11  ;;  %v2319_v28 = vld [vmem:[%s3002_s3 + $0xd8] sm:$0xff]   ;;  %v2329_v38 = vld [vmem:[%s3002_s3 + $0x88] sm:$0xff]   ;;  %v2330_v39 = vld [vmem:[%s3002_s3 + $0x40] sm:$0xff]   ;;  %v59_v51 = vsub.s32 1, %v2469_v11  ;;  %v67_v52 = vsub.s32 3, %v2469_v11 }
  0x10   :  { %v276_v59 = vand.u32 %v2475_v24, %v221_v55  ;;  %v2315_v24 = vld [vmem:[%s3002_s3 + $0xe0] sm:$0xff]   ;;  %v2335_v44 = vld [vmem:[%s3002_s3 + $0x1f8] sm:$0xff]   ;;  %vm1974_vm5 = vcmask 254976  }
  0x11   :  { %v2637_v50 = vld [vmem:[%s3003_s2] sm:$0xff] }
  0x12   :  { %v60_v55 = vrot.slane %v2637_v50, %v59_v51 }
  0x90   :  { %v34_v60 = vpop.xlane.xlu0 %33 }
  0x91   :  { %v41_v62 = vmul.f32 0.00390625, %v34_v60 }
  0x93   :  { %v43_v63 = vpack.c.bf16 %v41_v62, %v41_v62 }
  0x94   :  { %v39_v0 = vpop.xlane.xlu0 %38 }
  0x95   :  { %v42_v1 = vmul.f32 0.00390625, %v39_v0  ;;  %v135_v3 = vunpack.c.l.b16 %v43_v63 }
  0x97   :  { %v44_v4 = vpack.c.bf16 %v42_v1, %v42_v1  ;;  %v142_v6 = vrot.slane %v135_v3, %v141_v2  ;;  %v75_v1 = vsub.s32 5, %v2469_v11 }
  0x99   :  { %v136_v5 = vunpack.c.l.b16 %v44_v4 }
  0x9b   :  { %v146_v7 = vrot.slane %v136_v5, %v141_v2  ;;  %v83_v2 = vsub.s32 7, %v2469_v11 }
  0x9d   :  { %v148_v8 = vsel %vm147_vm3, %v146_v7, %v142_v6  ;;  %v2336_v7 = vld [vmem:[%s3002_s3 + $0x138] sm:$0xff]  }
  0x9e   :  { %v149_v9 = vpack.c.b16 %v148_v8, %v148_v8  ;;  %v2337_v8 = vld [vmem:[%s3002_s3 + $0x1b8] sm:$0xff]  }
  0xa0   :  { %1980 = vmatmul.mubr.msk.bf16.vlgmr.msra.gmra.mxu0 %vm222_vm4, %v149_v9  ;;  %1981 = vmatmul.mubr.msk.bf16.vlgmr.msra.gmra.mxu1 %vm222_vm4, %v149_v9 }
  0xa1   :  { %375 = vmatpush1.bf16.msra.mxu0 %v243_v36  ;;  %416 = vmatpush1.bf16.msra.mxu1 %v249_v37  ;;  %v2327_v36 = vld [vmem:[%s3002_s3 + $0xc8] sm:$0xff]  }
  0xa2   :  { %392 = vmatprep.mubr.bf16.mxu0 %v2432_v33  ;;  %433 = vmatprep.mubr.bf16.mxu1 %v2432_v33  ;;  %v2328_v37 = vld [vmem:[%s3002_s3 + $0x8] sm:$0xff]  }
  0xa3   :  { %456 = vmatprep.subr.bf16.mxu0 %v258_v48  ;;  %497 = vmatprep.subr.bf16.mxu1 %v264_v49  ;;  %v55_v48 = vsub.s32 0, %v2469_v11  ;;  %v63_v49 = vsub.s32 2, %v2469_v11 }
  0xa5   :  { %v56_v53 = vrot.slane %v2637_v50, %v55_v48  ;;  %v64_v54 = vrot.slane %v2637_v50, %v63_v49 }
  0xa8   :  { %1982 = vmatmul.mubr.msk.bf16.vlgmr.msra.gmra.mxu0 %vm222_vm4, %v149_v9  ;;  %1983 = vmatmul.mubr.msk.bf16.vlgmr.msra.gmra.mxu1 %vm222_vm4, %v149_v9 }
  0xa9   :  { %457 = vmatpush1.bf16.msra.mxu0 %v255_v46  ;;  %498 = vmatpush1.bf16.msra.mxu1 %v261_v47  ;;  %v2625_v46 = vld [vmem:[%s3003_s2 + $0x8] sm:$0xff] }
  0xaa   :  { %474 = vmatprep.mubr.bf16.mxu0 %v2432_v33  ;;  %515 = vmatprep.mubr.bf16.mxu1 %v2432_v33  ;;  %v2630_v47 = vrot.slane %v2625_v46, %v79_v45 }
  0xab   :  { %538 = vmatprep.subr.bf16.mxu0 %v270_v58  ;;  %579 = vmatprep.subr.bf16.mxu1 %v276_v59 }
  0xb0   :  { %1984 = vmatmul.mubr.msk.bf16.vlgmr.msra.gmra.mxu0 %vm222_vm4, %v149_v9  ;;  %1985 = vmatmul.mubr.msk.bf16.vlgmr.msra.gmra.mxu1 %vm222_vm4, %v149_v9 }
  0xb1   :  { %539 = vmatpush1.bf16.msra.mxu0 %v267_v56  ;;  %580 = vmatpush1.bf16.msra.mxu1 %v273_v57  ;;  %v68_v56 = vrot.slane %v2637_v50, %v67_v52 }
  0xb2   :  { %556 = vmatprep.mubr.bf16.mxu0 %v2432_v33  ;;  %597 = vmatprep.mubr.bf16.mxu1 %v2432_v33  ;;  %v2324_v33 = vld [vmem:[%s3002_s3 + $0x10] sm:$0xff]  }
  0xb3   :  { %2117 = vmatprep.subr.bf16.mxu0 %v2302_v10  ;;  %2139 = vmatprep.subr.bf16.mxu1 %v2303_v12 }
  0xb8   :  { %1986 = vmatmul.mubr.msk.bf16.vlgmr.msra.gmra.mxu0 %vm222_vm4, %v149_v9  ;;  %1987 = vmatmul.mubr.msk.bf16.vlgmr.msra.gmra.mxu1 %vm222_vm4, %v149_v9 }
  0xb9   :  { %2118 = vmatpush3.bf16.msra.mxu0 %v2304_v13  ;;  %2140 = vmatpush3.bf16.msra.mxu1 %v2305_v14  ;;  %v2338_v14 = vld [vmem:[%s3002_s3 + $0x170] sm:$0xff]  }
  0xba   :  { %2119 = vmatprep.subr.bf16.mxu0 %v2306_v15  ;;  %2141 = vmatprep.subr.bf16.mxu1 %v2307_v16  ;;  %v2339_v15 = vld [vmem:[%s3002_s3 + $0x1f0] sm:$0xff]   ;;  %v76_v16 = vrot.slane %v2637_v50, %v75_v1 }
  0xbd   :  { %2120 = vmatpush3.bf16.msra.mxu0 %v2308_v17  ;;  %2142 = vmatpush3.bf16.msra.mxu1 %v2309_v18  ;;  %v84_v17 = vrot.slane %v2637_v50, %v83_v2 }
  0xbe   :  { %2121 = vmatprep.subr.bf16.mxu0 %v2310_v19  ;;  %2143 = vmatprep.subr.bf16.mxu1 %v2311_v20  ;;  %v2340_v20 = vld [vmem:[%s3002_s3 + $0x130] sm:$0xff]  }
  0xc1   :  { %2122 = vmatpush3.bf16.msra.mxu0 %v2312_v21  ;;  %2144 = vmatpush3.bf16.msra.mxu1 %v2313_v22  ;;  %v2341_v21 = vld [vmem:[%s3002_s3 + $0x1b0] sm:$0xff]  }
  0xc2   :  { %2123 = vmatprep.subr.bf16.mxu0 %v2314_v23  ;;  %2145 = vmatprep.subr.bf16.mxu1 %v2315_v24  ;;  %v2342_v24 = vld [vmem:[%s3002_s3 + $0x168] sm:$0xff]  }
  0xc5   :  { %2124 = vmatpush3.bf16.msra.mxu0 %v2316_v25  ;;  %2146 = vmatpush3.bf16.msra.mxu1 %v2317_v26  ;;  %v2343_v25 = vld [vmem:[%s3002_s3 + $0x1e8] sm:$0xff]  }
  0xc6   :  { %2125 = vmatprep.subr.bf16.mxu0 %v2318_v27  ;;  %2147 = vmatprep.subr.bf16.mxu1 %v2319_v28 }
  0xc9   :  { %2126 = vmatpush3.bf16.msra.mxu0 %v2320_v29  ;;  %2148 = vmatpush3.bf16.msra.mxu1 %v2321_v30 }
  0xca   :  { %2127 = vmatprep.subr.bf16.mxu0 %v2322_v31  ;;  %2149 = vmatprep.subr.bf16.mxu1 %v2323_v32  ;;  %v2344_v32 = vld [vmem:[%s3002_s3 + $0x128] sm:$0xff]  }
  0xcd   :  { %2128 = vmatpush3.bf16.msra.mxu0 %v2324_v33  ;;  %2150 = vmatpush3.bf16.msra.mxu1 %v2325_v34  ;;  %v2345_v33 = vld [vmem:[%s3002_s3 + $0x1a8] sm:$0xff]  }
  0xce   :  { %2129 = vmatprep.subr.bf16.mxu0 %v2326_v35  ;;  %2151 = vmatprep.subr.bf16.mxu1 %v2327_v36  ;;  %v2346_v36 = vld [vmem:[%s3002_s3 + $0x160] sm:$0xff]  }
  0xd1   :  { %2130 = vmatpush3.bf16.msra.mxu0 %v2328_v37  ;;  %2152 = vmatpush3.bf16.msra.mxu1 %v2329_v38  ;;  %v2347_v37 = vld [vmem:[%s3002_s3 + $0x1e0] sm:$0xff]  }
  0xd2   :  { %2131 = vmatprep.subr.bf16.mxu0 %v2330_v39  ;;  %2153 = vmatprep.subr.bf16.mxu1 %v2331_v40  ;;  %v2348_v40 = vld [vmem:[%s3002_s3 + $0x120] sm:$0xff]  }
  0xd5   :  { %2132 = vmatpush3.bf16.msra.mxu0 %v2332_v41  ;;  %2154 = vmatpush3.bf16.msra.mxu1 %v2333_v42  ;;  %v2349_v41 = vld [vmem:[%s3002_s3 + $0x1a0] sm:$0xff]  }
  0xd6   :  { %2161 = vmatprep.subr.bf16.mxu0 %v2334_v43  ;;  %2183 = vmatprep.subr.bf16.mxu1 %v2335_v44  ;;  %v2350_v44 = vld [vmem:[%s3002_s3 + $0x158] sm:$0xff]  }
 0x160   :  { %v312_v57 = vpop.f32.mrf.mxu0  ;;  %v353_v58 = vpop.f32.mrf.mxu1 }
 0x161   :  { %v313_v59 = vadd.f32 %v312_v57, %v56_v53  ;;  %v354_v60 = vadd.f32 %v353_v58, %v64_v54  ;;  %v2351_v53 = vld [vmem:[%s3002_s3 + $0x1d8] sm:$0xff]   ;;  %v71_v54 = vsub.s32 4, %v2469_v11 }
 0x162   :  { %v314_v61 = vpop.f32.mrf.mxu0  ;;  %v355_v62 = vpop.f32.mrf.mxu1  ;;  %v2352_v58 = vld [vmem:[%s3002_s3 + $0x118] sm:$0xff]  }
 0x163   :  { %v315_v63 = vadd.f32 %v314_v61, %v60_v55  ;;  %v356_v0 = vadd.f32 %v355_v62, %v68_v56  ;;  %v606_v9 = vpack.c.bf16 %v313_v59, %v313_v59  ;;  %v608_v10 = vpack.c.bf16 %v354_v60, %v354_v60  ;;  %v2353_v59 = vld [vmem:[%s3002_s3 + $0x198] sm:$0xff]   ;;  %v2354_v62 = vld [vmem:[%s3002_s3 + $0x150] sm:$0xff]  }
 0x164   :  { %v316_v3 = vpop.f32.mrf.mxu0  ;;  %v357_v4 = vpop.f32.mrf.mxu1  ;;  %v104_v57 = vrot.slane %v2625_v46, %v71_v54 }
 0x165   :  { %v607_v5 = vpack.c.bf16 %v315_v63, %v315_v63  ;;  %v609_v6 = vpack.c.bf16 %v356_v0, %v356_v0  ;;  %v2355_v63 = vld [vmem:[%s3002_s3 + $0x1d0] sm:$0xff]  }
 0x166   :  { %v317_v12 = vpop.f32.mrf.mxu0  ;;  %v358_v13 = vpop.f32.mrf.mxu1 }
 0x167   :  { %1685 = vmatprep.mubr.bf16.mxu0 %v607_v5  ;;  %1725 = vmatprep.mubr.bf16.mxu1 %v609_v6  ;;  %v2356_v6 = vld [vmem:[%s3002_s3 + $0x110] sm:$0xff]  }
 0x168   :  { %v2673_v18 = vpop.f32.mrf.mxu0  ;;  %v2675_v19 = vpop.f32.mrf.mxu1  ;;  %1686 = vmatmul.mubr.bf16.vlgmr.msra.gmra.mxu0 %v606_v9  ;;  %1726 = vmatmul.mubr.bf16.vlgmr.msra.gmra.mxu1 %v608_v10  ;;  %v2359_v10 = vld [vmem:[%s3002_s3 + $0x1c8] sm:$0xff]  }
 0x169   :  { %2162 = vmatpush3.bf16.msra.mxu0 %v2336_v7  ;;  %2184 = vmatpush3.bf16.msra.mxu1 %v2337_v8  ;;  %v2357_v7 = vld [vmem:[%s3002_s3 + $0x190] sm:$0xff]  }
 0x16a   :  { %v396_v22 = vpop.f32.mrf.mxu0  ;;  %v437_v23 = vpop.f32.mrf.mxu1  ;;  %2163 = vmatprep.subr.bf16.mxu0 %v2338_v14  ;;  %2185 = vmatprep.subr.bf16.mxu1 %v2339_v15  ;;  %v2360_v14 = vld [vmem:[%s3002_s3 + $0x108] sm:$0xff]  }
 0x16b   :  { %v397_v26 = vadd.f32 %v396_v22, %v76_v16  ;;  %v438_v27 = vadd.f32 %v437_v23, %v84_v17  ;;  %v2361_v15 = vld [vmem:[%s3002_s3 + $0x188] sm:$0xff]   ;;  %v72_v16 = vrot.slane %v2637_v50, %v71_v54  ;;  %v80_v17 = vrot.slane %v2637_v50, %v79_v45  ;;  %v2362_v22 = vld [vmem:[%s3002_s3 + $0x140] sm:$0xff]  }
 0x16c   :  { %v398_v28 = vpop.f32.mrf.mxu0  ;;  %v439_v29 = vpop.f32.mrf.mxu1  ;;  %v2363_v23 = vld [vmem:[%s3002_s3 + $0x1c0] sm:$0xff]   ;;  %v100_v45 = vrot.slane %v2625_v46, %v67_v52  ;;  %v2367_v52 = vld [vmem:[%s3002_s3 + $0x2f8] sm:$0xff]  }
 0x16d   :  { %v611_v30 = vpack.c.bf16 %v397_v26, %v397_v26  ;;  %v613_v31 = vpack.c.bf16 %v438_v27, %v438_v27  ;;  %2164 = vmatpush3.bf16.msra.mxu0 %v2340_v20  ;;  %2186 = vmatpush3.bf16.msra.mxu1 %v2341_v21  ;;  %v2364_v50 = vld [vmem:[%s3002_s3 + $0x100] sm:$0xff]   ;;  %v395_v26 = vadd.f32 %v2673_v18, %v72_v16  ;;  %v2368_v18 = vld [vmem:[%s3002_s3 + $0x238] sm:$0xff]  }
 0x16e   :  { %v399_v34 = vpop.f32.mrf.mxu0  ;;  %v440_v35 = vpop.f32.mrf.mxu1  ;;  %2165 = vmatprep.subr.bf16.mxu0 %v2342_v24  ;;  %2187 = vmatprep.subr.bf16.mxu1 %v2343_v25  ;;  %v92_v24 = vrot.slane %v2625_v46, %v59_v51  ;;  %v2365_v25 = vld [vmem:[%s3002_s3 + $0x180] sm:$0xff]   ;;  %v436_v27 = vadd.f32 %v2675_v19, %v80_v17  ;;  %v2366_v51 = vld [vmem:[%s3002_s3 + $0x278] sm:$0xff]  }
 0x16f   :  { %1765 = vmatprep.mubr.bf16.mxu0 %v611_v30  ;;  %1805 = vmatprep.mubr.bf16.mxu1 %v613_v31  ;;  %v610_v30 = vpack.c.bf16 %v395_v26, %v395_v26  ;;  %v2369_v31 = vld [vmem:[%s3002_s3 + $0x2b8] sm:$0xff]   ;;  %v2371_v34 = vld [vmem:[%s3002_s3 + $0x2f0] sm:$0xff]   ;;  %v2380_v54 = vld [vmem:[%s3002_s3 + $0x220] sm:$0xff]  }
 0x170   :  { %v2701_v38 = vpop.f32.mrf.mxu0  ;;  %v2703_v39 = vpop.f32.mrf.mxu1  ;;  %v612_v19 = vpack.c.bf16 %v436_v27, %v436_v27  ;;  %v2397_v16 = vld [vmem:[%s3002_s3 + $0x280] sm:$0xff]   ;;  %v2400_v17 = vld [vmem:[%s3002_s3 + $0x338] sm:$0xff]   ;;  %v2408_v26 = vld [vmem:[%s3002_s3 + $0x328] sm:$0xff]  }
 0x171   :  { %2166 = vmatpush3.bf16.msra.mxu0 %v2344_v32  ;;  %2188 = vmatpush3.bf16.msra.mxu1 %v2345_v33  ;;  %v2370_v33 = vld [vmem:[%s3002_s3 + $0x270] sm:$0xff]   ;;  %v2409_v27 = vld [vmem:[%s3002_s3 + $0x3a8] sm:$0xff]  }
 0x172   :  { %v478_v42 = vpop.f32.mrf.mxu0  ;;  %v519_v43 = vpop.f32.mrf.mxu1  ;;  %2167 = vmatprep.subr.bf16.mxu0 %v2346_v36  ;;  %2189 = vmatprep.subr.bf16.mxu1 %v2347_v37  ;;  %v2372_v36 = vld [vmem:[%s3002_s3 + $0x230] sm:$0xff]  }
 0x173   :  { %v479_v28 = vadd.f32 %v478_v42, %v92_v24  ;;  %v520_v29 = vadd.f32 %v519_v43, %v100_v45  ;;  %v2373_v37 = vld [vmem:[%s3002_s3 + $0x2b0] sm:$0xff]   ;;  %v2376_v42 = vld [vmem:[%s3002_s3 + $0x228] sm:$0xff]  }
 0x174   :  { %v480_v55 = vpop.f32.mrf.mxu0  ;;  %v521_v56 = vpop.f32.mrf.mxu1  ;;  %v2377_v43 = vld [vmem:[%s3002_s3 + $0x2a8] sm:$0xff]   ;;  %v2404_v24 = vld [vmem:[%s3002_s3 + $0x330] sm:$0xff]  }
 0x175   :  { %2168 = vmatpush3.bf16.msra.mxu0 %v2348_v40  ;;  %2190 = vmatpush3.bf16.msra.mxu1 %v2349_v41  ;;  %v615_v32 = vpack.c.bf16 %v479_v28, %v479_v28  ;;  %v617_v35 = vpack.c.bf16 %v520_v29, %v520_v29  ;;  %v2374_v40 = vld [vmem:[%s3002_s3 + $0x268] sm:$0xff]   ;;  %v2381_v55 = vld [vmem:[%s3002_s3 + $0x2a0] sm:$0xff]   ;;  %v2382_v56 = vld [vmem:[%s3002_s3 + $0x258] sm:$0xff]  }
 0x176   :  { %v481_v60 = vpop.f32.mrf.mxu0  ;;  %v522_v61 = vpop.f32.mrf.mxu1  ;;  %2169 = vmatprep.subr.bf16.mxu0 %v2350_v44  ;;  %2191 = vmatprep.subr.bf16.mxu1 %v2351_v53  ;;  %v2375_v41 = vld [vmem:[%s3002_s3 + $0x2e8] sm:$0xff]   ;;  %v2378_v44 = vld [vmem:[%s3002_s3 + $0x260] sm:$0xff]   ;;  %v2405_v45 = vld [vmem:[%s3002_s3 + $0x3b0] sm:$0xff]  }
 0x177   :  { %v2379_v53 = vld [vmem:[%s3002_s3 + $0x2e0] sm:$0xff]   ;;  %v2386_v60 = vld [vmem:[%s3002_s3 + $0x250] sm:$0xff]  }
 0x178   :  { %v558_v0 = vpop.f32.mrf.mxu0  ;;  %v599_v3 = vpop.f32.mrf.mxu1  ;;  %v2387_v61 = vld [vmem:[%s3002_s3 + $0x2d0] sm:$0xff]   ;;  %v2412_v28 = vld [vmem:[%s3002_s3 + $0x320] sm:$0xff]  }
 0x179   :  { %v2731_v4 = vadd.f32 %v558_v0, %v104_v57  ;;  %v2734_v5 = vadd.f32 %v599_v3, %v2630_v47  ;;  %2170 = vmatpush3.bf16.msra.mxu0 %v2352_v58  ;;  %2192 = vmatpush3.bf16.msra.mxu1 %v2353_v59  ;;  %v2358_v47 = vld [vmem:[%s3002_s3 + $0x148] sm:$0xff]   ;;  %v2383_v57 = vld [vmem:[%s3002_s3 + $0x2d8] sm:$0xff]   ;;  %v2413_v29 = vld [vmem:[%s3002_s3 + $0x3a0] sm:$0xff]  }
 0x17a   :  { %v2742_v8 = vpop.f32.mrf.mxu0  ;;  %v2744_v9 = vpop.f32.mrf.mxu1  ;;  %2171 = vmatprep.subr.bf16.mxu0 %v2354_v62  ;;  %2193 = vmatprep.subr.bf16.mxu1 %v2355_v63  ;;  %v2384_v58 = vld [vmem:[%s3002_s3 + $0x218] sm:$0xff]   ;;  %v2388_v62 = vld [vmem:[%s3002_s3 + $0x210] sm:$0xff]   ;;  %v2390_v0 = vld [vmem:[%s3002_s3 + $0x248] sm:$0xff]  }
 0x17b   :  { %v2385_v59 = vld [vmem:[%s3002_s3 + $0x298] sm:$0xff]   ;;  %v2389_v63 = vld [vmem:[%s3002_s3 + $0x290] sm:$0xff]   ;;  %v2391_v3 = vld [vmem:[%s3002_s3 + $0x2c8] sm:$0xff]  }
 0x17c   :  { %v562_v12 = vpop.f32.mrf.mxu0  ;;  %v603_v13 = vpop.f32.mrf.mxu1 }
 0x17d   :  { %2172 = vmatpush3.bf16.msra.mxu0 %v2356_v6  ;;  %2194 = vmatpush3.bf16.msra.mxu1 %v2357_v7  ;;  %v2392_v6 = vld [vmem:[%s3002_s3 + $0x208] sm:$0xff]   ;;  %v88_v7 = vrot.slane %v2625_v46, %v55_v48  ;;  %v96_v12 = vrot.slane %v2625_v46, %v63_v49  ;;  %v2395_v13 = vld [vmem:[%s3002_s3 + $0x2c0] sm:$0xff]   ;;  %v108_v48 = vrot.slane %v2625_v46, %v75_v1  ;;  %v2398_v1 = vld [vmem:[%s3002_s3 + $0x378] sm:$0xff]  }
 0x17e   :  { %v563_v20 = vpop.f32.mrf.mxu0  ;;  %v604_v21 = vpop.f32.mrf.mxu1  ;;  %2173 = vmatprep.subr.bf16.mxu0 %v2358_v47  ;;  %2195 = vmatprep.subr.bf16.mxu1 %v2359_v10  ;;  %v2393_v47 = vld [vmem:[%s3002_s3 + $0x288] sm:$0xff]   ;;  %v2394_v10 = vld [vmem:[%s3002_s3 + $0x240] sm:$0xff]  }
 0x17f   :  { %v477_v49 = vadd.f32 %v2701_v38, %v88_v7  ;;  %v518_v11 = vadd.f32 %v2703_v39, %v96_v12  ;;  %v2401_v39 = vld [vmem:[%s3002_s3 + $0x3b8] sm:$0xff]  }
 0x181   :  { %2174 = vmatpush3.bf16.msra.mxu0 %v2360_v14  ;;  %2196 = vmatpush3.bf16.msra.mxu1 %v2361_v15  ;;  %v116_v14 = vrot.slane %v2625_v46, %v83_v2  ;;  %v2396_v15 = vld [vmem:[%s3002_s3 + $0x200] sm:$0xff]   ;;  %v2399_v46 = vld [vmem:[%s3002_s3 + $0x3f8] sm:$0xff]   ;;  %v561_v2 = vadd.f32 %v2742_v8, %v108_v48  ;;  %v614_v20 = vpack.c.bf16 %v477_v49, %v477_v49  ;;  %v2402_v8 = vld [vmem:[%s3002_s3 + $0x370] sm:$0xff]  }
 0x182   :  { %2175 = vmatprep.subr.bf16.mxu0 %v2362_v22  ;;  %2197 = vmatprep.subr.bf16.mxu1 %v2363_v23  ;;  %v616_v21 = vpack.c.bf16 %v518_v11, %v518_v11 }
 0x183   :  { %v602_v38 = vadd.f32 %v2744_v9, %v116_v14  ;;  %v619_v22 = vpack.c.bf16 %v561_v2, %v561_v2  ;;  %v2403_v9 = vld [vmem:[%s3002_s3 + $0x3f0] sm:$0xff]  }
 0x185   :  { %2176 = vmatpush3.bf16.msra.mxu0 %v2364_v50  ;;  %2198 = vmatpush3.bf16.msra.mxu1 %v2365_v25  ;;  %v621_v23 = vpack.c.bf16 %v602_v38, %v602_v38  ;;  %v2406_v50 = vld [vmem:[%s3002_s3 + $0x368] sm:$0xff]  }
 0x186   :  { %2205 = vmatprep.subr.bf16.mxu0 %v2366_v51  ;;  %2227 = vmatprep.subr.bf16.mxu1 %v2367_v52  ;;  %v2407_v25 = vld [vmem:[%s3002_s3 + $0x3e8] sm:$0xff]   ;;  %v2410_v51 = vld [vmem:[%s3002_s3 + $0x360] sm:$0xff]  }
 0x187   :  { %v2411_v52 = vld [vmem:[%s3002_s3 + $0x3e0] sm:$0xff]  }
 0x188   :  { %1766 = vmatmul.mubr.bf16.vlgmr.msra.gmra.mxu0 %v610_v30  ;;  %1806 = vmatmul.mubr.bf16.vlgmr.msra.gmra.mxu1 %v612_v19  ;;  %v2415_v30 = vld [vmem:[%s3002_s3 + $0x3d8] sm:$0xff]  }
 0x189   :  { %2206 = vmatpush3.bf16.msra.mxu0 %v2368_v18  ;;  %1845 = vmatprep.mubr.bf16.mxu0 %v615_v32  ;;  %v2414_v18 = vld [vmem:[%s3002_s3 + $0x358] sm:$0xff]   ;;  %v2418_v32 = vld [vmem:[%s3002_s3 + $0x350] sm:$0xff]  }
 0x18a   :  { %2228 = vmatpush3.bf16.msra.mxu1 %v2369_v31  ;;  %1885 = vmatprep.mubr.bf16.mxu1 %v617_v35  ;;  %v2416_v19 = vld [vmem:[%s3002_s3 + $0x318] sm:$0xff]   ;;  %v2421_v35 = vld [vmem:[%s3002_s3 + $0x390] sm:$0xff]  }
 0x18b   :  { %2207 = vmatprep.subr.bf16.mxu0 %v2370_v33  ;;  %2229 = vmatprep.subr.bf16.mxu1 %v2371_v34  ;;  %v2417_v31 = vld [vmem:[%s3002_s3 + $0x398] sm:$0xff]   ;;  %v2419_v33 = vld [vmem:[%s3002_s3 + $0x3d0] sm:$0xff]  }
 0x18c   :  { %v2420_v34 = vld [vmem:[%s3002_s3 + $0x310] sm:$0xff]  }
 0x18d   :  { %2208 = vmatpush3.bf16.msra.mxu0 %v2372_v36  ;;  %v2422_v36 = vld [vmem:[%s3002_s3 + $0x348] sm:$0xff]  }
 0x18e   :  { %2230 = vmatpush3.bf16.msra.mxu1 %v2373_v37  ;;  %2209 = vmatprep.subr.bf16.mxu0 %v2374_v40  ;;  %v2423_v37 = vld [vmem:[%s3002_s3 + $0x3c8] sm:$0xff]  }
 0x18f   :  { %2231 = vmatprep.subr.bf16.mxu1 %v2375_v41  ;;  %v2424_v40 = vld [vmem:[%s3002_s3 + $0x308] sm:$0xff]  }
 0x190   :  { %v2425_v41 = vld [vmem:[%s3002_s3 + $0x388] sm:$0xff]  }
 0x191   :  { %2210 = vmatpush3.bf16.msra.mxu0 %v2376_v42  ;;  %v2426_v42 = vld [vmem:[%s3002_s3 + $0x340] sm:$0xff]  }
 0x192   :  { %2232 = vmatpush3.bf16.msra.mxu1 %v2377_v43  ;;  %2211 = vmatprep.subr.bf16.mxu0 %v2378_v44  ;;  %v2427_v43 = vld [vmem:[%s3002_s3 + $0x3c0] sm:$0xff]  }
 0x193   :  { %2233 = vmatprep.subr.bf16.mxu1 %v2379_v53  ;;  %v2428_v44 = vld [vmem:[%s3002_s3 + $0x300] sm:$0xff]  }
 0x194   :  { %v2429_v53 = vld [vmem:[%s3002_s3 + $0x380] sm:$0xff]  }
 0x195   :  { %2212 = vmatpush3.bf16.msra.mxu0 %v2380_v54  ;;  %v618_v54 = vpack.c.bf16 %v2731_v4, %v2731_v4 }
 0x196   :  { %2234 = vmatpush3.bf16.msra.mxu1 %v2381_v55  ;;  %2213 = vmatprep.subr.bf16.mxu0 %v2382_v56  ;;  %v620_v55 = vpack.c.bf16 %v2734_v5, %v2734_v5 }
 0x197   :  { %2235 = vmatprep.subr.bf16.mxu1 %v2383_v57 }
 0x199   :  { %2214 = vmatpush3.bf16.msra.mxu0 %v2384_v58  ;;  %v1988_v58 = vld [vmem:[%s3004_s4] ss:$0 sm:$0xff] }
 0x19a   :  { %2236 = vmatpush3.bf16.msra.mxu1 %v2385_v59  ;;  %2215 = vmatprep.subr.bf16.mxu0 %v2386_v60 }
 0x19b   :  { %2237 = vmatprep.subr.bf16.mxu1 %v2387_v61 }
 0x19d   :  { %2216 = vmatpush3.bf16.msra.mxu0 %v2388_v62 }
 0x19e   :  { %2238 = vmatpush3.bf16.msra.mxu1 %v2389_v63  ;;  %2217 = vmatprep.subr.bf16.mxu0 %v2390_v0 }
 0x19f   :  { %2239 = vmatprep.subr.bf16.mxu1 %v2391_v3 }
 0x1a1   :  { %2218 = vmatpush3.bf16.msra.mxu0 %v2392_v6 }
 0x1a2   :  { %2240 = vmatpush3.bf16.msra.mxu1 %v2393_v47  ;;  %2219 = vmatprep.subr.bf16.mxu0 %v2394_v10 }
 0x1a3   :  { %2241 = vmatprep.subr.bf16.mxu1 %v2395_v13 }
 0x1a5   :  { %2220 = vmatpush3.bf16.msra.mxu0 %v2396_v15 }
 0x1a6   :  { %2242 = vmatpush3.bf16.msra.mxu1 %v2397_v16  ;;  %2249 = vmatprep.subr.bf16.mxu0 %v2398_v1 }
 0x1a7   :  { %2271 = vmatprep.subr.bf16.mxu1 %v2399_v46 }
 0x1a8   :  { %1846 = vmatmul.mubr.bf16.vlgmr.msra.gmra.mxu0 %v614_v20 }
 0x1a9   :  { %1886 = vmatmul.mubr.bf16.vlgmr.msra.gmra.mxu1 %v616_v21  ;;  %2250 = vmatpush3.bf16.msra.mxu0 %v2400_v17 }
 0x1aa   :  { %1925 = vmatprep.mubr.bf16.mxu0 %v619_v22  ;;  %2272 = vmatpush3.bf16.msra.mxu1 %v2401_v39 }
 0x1ab   :  { %1965 = vmatprep.mubr.bf16.mxu1 %v621_v23  ;;  %2251 = vmatprep.subr.bf16.mxu0 %v2402_v8 }
 0x1ac   :  { %2273 = vmatprep.subr.bf16.mxu1 %v2403_v9 }
 0x1ad   :  { %2252 = vmatpush3.bf16.msra.mxu0 %v2404_v24 }
 0x1ae   :  { %2274 = vmatpush3.bf16.msra.mxu1 %v2405_v45  ;;  %2253 = vmatprep.subr.bf16.mxu0 %v2406_v50 }
 0x1af   :  { %2275 = vmatprep.subr.bf16.mxu1 %v2407_v25 }
 0x1b1   :  { %2254 = vmatpush3.bf16.msra.mxu0 %v2408_v26 }
 0x1b2   :  { %2276 = vmatpush3.bf16.msra.mxu1 %v2409_v27  ;;  %2255 = vmatprep.subr.bf16.mxu0 %v2410_v51 }
 0x1b3   :  { %2277 = vmatprep.subr.bf16.mxu1 %v2411_v52 }
 0x1b5   :  { %2256 = vmatpush3.bf16.msra.mxu0 %v2412_v28 }
 0x1b6   :  { %2278 = vmatpush3.bf16.msra.mxu1 %v2413_v29  ;;  %2257 = vmatprep.subr.bf16.mxu0 %v2414_v18 }
 0x1b7   :  { %2279 = vmatprep.subr.bf16.mxu1 %v2415_v30 }
 0x1b9   :  { %2258 = vmatpush3.bf16.msra.mxu0 %v2416_v19 }
 0x1ba   :  { %2280 = vmatpush3.bf16.msra.mxu1 %v2417_v31  ;;  %2259 = vmatprep.subr.bf16.mxu0 %v2418_v32 }
 0x1bb   :  { %2281 = vmatprep.subr.bf16.mxu1 %v2419_v33 }
 0x1bd   :  { %2260 = vmatpush3.bf16.msra.mxu0 %v2420_v34 }
 0x1be   :  { %2282 = vmatpush3.bf16.msra.mxu1 %v2421_v35  ;;  %2261 = vmatprep.subr.bf16.mxu0 %v2422_v36 }
 0x1bf   :  { %2283 = vmatprep.subr.bf16.mxu1 %v2423_v37 }
 0x1c1   :  { %2262 = vmatpush3.bf16.msra.mxu0 %v2424_v40 }
 0x1c2   :  { %2284 = vmatpush3.bf16.msra.mxu1 %v2425_v41  ;;  %2263 = vmatprep.subr.bf16.mxu0 %v2426_v42 }
 0x1c3   :  { %2285 = vmatprep.subr.bf16.mxu1 %v2427_v43 }
 0x1c5   :  { %2264 = vmatpush3.bf16.msra.mxu0 %v2428_v44 }
 0x1c6   :  { %2286 = vmatpush3.bf16.msra.mxu1 %v2429_v53 }
 0x1c8   :  { %1926 = vmatmul.mubr.bf16.vlgmr.msra.gmra.mxu0 %v618_v54 }
 0x1c9   :  { %1966 = vmatmul.mubr.bf16.vlgmr.msra.gmra.mxu1 %v620_v55 }
 0x228   :  { %v2133_v56 = vpop.f32.mrf.mxu0  ;;  %v2155_v57 = vpop.f32.mrf.mxu1 }
 0x22a   :  { %v2134_v59 = vpop.f32.mrf.mxu0  ;;  %v2156_v60 = vpop.f32.mrf.mxu1 }
 0x22b   :  { %v2135_v61 = vadd.f32 %v2134_v59, %v2133_v56  ;;  %v2157_v62 = vadd.f32 %v2156_v60, %v2155_v57 }
 0x22c   :  { %v2136_v63 = vpop.f32.mrf.mxu0  ;;  %v2158_v0 = vpop.f32.mrf.mxu1 }
 0x22d   :  { %v1688_v3 = vadd.f32 %v2135_v61, %v1988_v58 }
 0x22e   :  { %v2137_v4 = vpop.f32.mrf.mxu0  ;;  %v2159_v6 = vpop.f32.mrf.mxu1 }
 0x22f   :  { %v1728_v7 = vadd.f32 %v2157_v62, %v1688_v3 }
 0x248   :  { %v2177_v47 = vpop.f32.mrf.mxu0  ;;  %v2199_v5 = vpop.f32.mrf.mxu1 }
 0x24a   :  { %v2178_v10 = vpop.f32.mrf.mxu0  ;;  %v2200_v12 = vpop.f32.mrf.mxu1 }
 0x24b   :  { %v2179_v20 = vadd.f32 %v2178_v10, %v2177_v47  ;;  %v2201_v21 = vadd.f32 %v2200_v12, %v2199_v5 }
 0x24c   :  { %v2180_v13 = vpop.f32.mrf.mxu0  ;;  %v2202_v48 = vpop.f32.mrf.mxu1 }
 0x24d   :  { %v1768_v39 = vadd.f32 %v2179_v20, %v1728_v7 }
 0x24e   :  { %v2181_v14 = vpop.f32.mrf.mxu0  ;;  %v2203_v15 = vpop.f32.mrf.mxu1 }
 0x24f   :  { %v1808_v22 = vadd.f32 %v2201_v21, %v1768_v39 }
 0x268   :  { %v2221_v49 = vpop.f32.mrf.mxu0 }
 0x269   :  { %v2243_v16 = vpop.f32.mrf.mxu1 }
 0x26a   :  { %v2222_v1 = vpop.f32.mrf.mxu0 }
 0x26b   :  { %v2244_v11 = vpop.f32.mrf.mxu1  ;;  %v2223_v8 = vadd.f32 %v2222_v1, %v2221_v49 }
 0x26c   :  { %v2224_v46 = vpop.f32.mrf.mxu0  ;;  %v2245_v24 = vadd.f32 %v2244_v11, %v2243_v16 }
 0x26d   :  { %v2246_v2 = vpop.f32.mrf.mxu1  ;;  %v1848_v9 = vadd.f32 %v2223_v8, %v1808_v22 }
 0x26e   :  { %v2225_v38 = vpop.f32.mrf.mxu0 }
 0x26f   :  { %v2247_v17 = vpop.f32.mrf.mxu1  ;;  %v1888_v25 = vadd.f32 %v2245_v24, %v1848_v9 }
 0x288   :  { %v2265_v23 = vpop.f32.mrf.mxu0 }
 0x289   :  { %v2287_v45 = vpop.f32.mrf.mxu1 }
 0x28a   :  { %v2266_v50 = vpop.f32.mrf.mxu0 }
 0x28b   :  { %v2267_v26 = vadd.f32 %v2266_v50, %v2265_v23  ;;  %v2288_v27 = vpop.f32.mrf.mxu1 }
 0x28c   :  { %v2268_v51 = vpop.f32.mrf.mxu0  ;;  %v2289_v28 = vadd.f32 %v2288_v27, %v2287_v45 }
 0x28d   :  { %v1928_v52 = vadd.f32 %v2267_v26, %v1888_v25  ;;  %v2290_v29 = vpop.f32.mrf.mxu1 }
 0x28e   :  { %v2269_v18 = vpop.f32.mrf.mxu0 }
 0x28f   :  { %v1968_v30 = vadd.f32 %v2289_v28, %v1928_v52  ;;  %v2291_v19 = vpop.f32.mrf.mxu1 }
 0x291   :  { %v1973_v31 = vmax.f32 %v1968_v30, 0.0 }
 0x293   :  { %1975 = vst.msk [vmem:[%s3005_s5] sm:$0x3] %vm1974_vm5, %v1973_v31 }

</bundles_post_ra>
